<compile_context>
chip_gen: v6e
topology: v6e:2x2x1
jax: 0.10.0
libtpu: 0.0.40
codegen_flags: <defaults>
</compile_context>

<pallas_src>
import jax
import jax.numpy as jnp
from jax.experimental import pallas as pl
from jax.experimental.pallas import tpu as pltpu


# -----------------------------------------------------------------------------
# Pallas kernel: full decoder forward (single invocation, everything in VMEM)
# -----------------------------------------------------------------------------
def decoder_kernel(x_enc_ref, y_prev_ref, w1_t_ref, w_gate_ref, vecs_ref,
                   out_ref):
    X = x_enc_ref[...]                       # (B, Tm1, E)
    B, Tm1, E = X.shape
    four_d = w_gate_ref.shape[1]
    D = four_d // 4

    # ---- weight slabs, sliced once (sublane-aligned offsets for D=E=32) ----
    w1_dc = w1_t_ref[0:2 * D, :]             # (2D, E)  attn W1 rows for [d ; c]
    w1_x = w1_t_ref[2 * D:2 * D + E, :]      # (E, E)   attn W1 rows for X
    w_gate = w_gate_ref[...]                 # (D+E,4D) [w_hh^T ; w_ce]

    vecs = vecs_ref[...]                     # (8, 128) packed small vectors
    b1_row = vecs[0:1, 0:E]                  # attn first-linear bias
    w2_row = vecs[1:2, 0:E]                  # attn second-linear weight
    wf_d_row = vecs[2:3, 0:D]                # fc_final weight (d part)
    wf_e_row = vecs[3:4, 0:E]                # fc_final weight (context part)
    bf = vecs[4:5, 0:1]                      # fc_final bias
    w_y_row = vecs[5:6, 0:four_d]            # y_prev -> gates (fused fc/w_ih)
    b_tot_row = vecs[6:7, 0:four_d]          # b_fc*w_ih + b_ih + b_hh

    y_prev = y_prev_ref[...]                 # (B, Tm1)

    # ---- loop-invariant attention projection of X (+ b1), kept in vregs ----
    # B tiny & static: B small 2-D matmuls, no scratch / VMEM round trip.
    x_proj = jnp.concatenate(
        [jnp.dot(X[b], w1_x, preferred_element_type=jnp.float32)[None]
         for b in range(B)], axis=0) + b1_row                 # (B, Tm1, E)

    # Hoisted broadcast (JAX does not CSE broadcast_in_dim across the unroll).
    w2_b = jnp.broadcast_to(w2_row.reshape(1, 1, E), (B, Tm1, E))

    d = jnp.zeros((B, D), jnp.float32)
    c = jnp.zeros((B, D), jnp.float32)
    ctx = jnp.zeros((B, E), jnp.float32)

    # ---- fully-unrolled T-1 step recurrence ---------------------------------
    for t in range(Tm1):
        # attention: Linear(2D+E -> E) -> tanh -> Linear(E -> 1); b2 is a
        # uniform shift before softmax, hence omitted (no-op).
        dc = jnp.concatenate([d, c], axis=1)                   # (B, 2D)
        dc_proj = jnp.dot(dc, w1_dc,
                          preferred_element_type=jnp.float32)  # (B, E)
        h1 = jnp.tanh(x_proj + dc_proj[:, None, :])            # (B, Tm1, E)
        scores = jnp.sum(h1 * w2_b, axis=2)                    # (B, Tm1)

        # softmax over Tm1; no max-shift (|scores| <= ||W2||_1, checked in the
        # wrapper to stay far below the f32 exp overflow threshold).
        e = jnp.exp(scores)
        beta = e * pl.reciprocal(jnp.sum(e, axis=1, keepdims=True),
                                 approx=True)                  # (B, Tm1)

        # context = bmm(beta.unsqueeze(1), X_encoded)[:, 0, :]
        ctx = jnp.sum(beta[:, :, None] * X, axis=1)            # (B, E)

        # fused fc + single LSTM cell step (gate order i, f, g, o):
        # one merged MXU matmul against the stacked slab, plus one VPU FMA
        # for the y_prev / bias contribution (off the critical chain).
        y_gate_t = y_prev[:, t:t + 1] * w_y_row + b_tot_row    # (B, 4D)
        dctx = jnp.concatenate([d, ctx], axis=1)               # (B, D+E)
        gates = (jnp.dot(dctx, w_gate, preferred_element_type=jnp.float32)
                 + y_gate_t)                                   # (B, 4D)
        sig = 0.5 * jnp.tanh(0.5 * gates) + 0.5                # sigmoid via tanh
        tan = jnp.tanh(gates)
        i_g = sig[:, 0:D]
        f_g = sig[:, D:2 * D]
        g_g = tan[:, 2 * D:3 * D]
        o_g = sig[:, 3 * D:4 * D]
        c = f_g * c + i_g * g_g
        d = o_g * jnp.tanh(c)

    # ---- fc_final: Linear(D + E -> 1) on cat((d_n[0], context), dim=1) ------
    y_pred = (jnp.sum(d * wf_d_row, axis=1, keepdims=True)
              + jnp.sum(ctx * wf_e_row, axis=1, keepdims=True)
              + bf)                                            # (B, 1)
    out_ref[...] = y_pred.astype(out_ref.dtype)


# -----------------------------------------------------------------------------
# Parameter setup: PyTorch layouts -> fused / packed kernel layouts
# -----------------------------------------------------------------------------
def init_params(key, T, D, E, scale=0.1):
    """Deterministic synthetic parameters in PyTorch layouts."""
    ks = jax.random.split(key, 12)
    return {
        'W1': jax.random.normal(ks[0], (E, 2 * D + E), jnp.float32) * scale,
        'b1': jax.random.normal(ks[1], (E,), jnp.float32) * scale,
        'W2': jax.random.normal(ks[2], (1, E), jnp.float32) * scale,
        'b2': jax.random.normal(ks[3], (1,), jnp.float32) * scale,
        'w_ih': jax.random.normal(ks[4], (4 * D, 1), jnp.float32) * scale,
        'w_hh': jax.random.normal(ks[5], (4 * D, D), jnp.float32) * scale,
        'b_ih': jax.random.normal(ks[6], (4 * D,), jnp.float32) * scale,
        'b_hh': jax.random.normal(ks[7], (4 * D,), jnp.float32) * scale,
        'Wfc': jax.random.normal(ks[8], (1, E + 1), jnp.float32),  # .normal_()
        'bfc': jax.random.normal(ks[9], (1,), jnp.float32) * scale,
        'Wff': jax.random.normal(ks[10], (1, D + E), jnp.float32) * scale,
        'bff': jax.random.normal(ks[11], (1,), jnp.float32) * scale,
    }


def to_kernel_params(p, D, E):
    """Fuse fc into the LSTM gate matmul and pack small operands into slabs."""
    w_ih_row = p['w_ih'][:, 0]                            # (4D,)
    w_fc_e = p['Wfc'][0, :E]                              # (E,)
    w_fc_y = p['Wfc'][0, E]                               # scalar
    w_ce = w_fc_e[:, None] * w_ih_row[None, :]            # (E, 4D)
    w_y = w_fc_y * w_ih_row                               # (4D,)
    b_total = p['bfc'][0] * w_ih_row + p['b_ih'] + p['b_hh']   # (4D,)

    # Static guard for the in-kernel softmax without max-shift:
    # |scores| <= ||W2||_1 (since |tanh|<=1), must stay well below ~88 (f32 exp).
    assert float(jnp.sum(jnp.abs(p['W2']))) < 60.0, "W2 too large for no-shift softmax"

    # One (8,128) VMEM slab for every small bias / weight row (single tile).
    vecs = jnp.zeros((8, 128), jnp.float32)
    vecs = vecs.at[0, :E].set(p['b1'])
    vecs = vecs.at[1, :E].set(p['W2'][0])
    vecs = vecs.at[2, :D].set(p['Wff'][0, :D])
    vecs = vecs.at[3, :E].set(p['Wff'][0, D:])
    vecs = vecs.at[4, 0].set(p['bff'][0])
    vecs = vecs.at[5, :4 * D].set(w_y)
    vecs = vecs.at[6, :4 * D].set(b_total)
    # NOTE: b2 is intentionally dropped — uniform shift before softmax.

    return {
        'w1_t': p['W1'].T,                                      # (2D+E, E)
        'w_gate': jnp.concatenate([p['w_hh'].T, w_ce], axis=0), # (D+E, 4D)
        'vecs': vecs,
    }


def decoder_forward(X_encoded, y_prev, kp):
    B, Tm1, E = X_encoded.shape
    # NOTE(perf): for production workloads with large B, add a batch grid with
    # dimension_semantics=("parallel",) and per-block BlockSpecs on
    # X_encoded / y_prev / out; at B=2 a grid-less call is cheapest (v7x's
    # second TensorCore only pays off with ~256-row blocks per core).
    return pl.pallas_call(
        decoder_kernel,
        out_shape=jax.ShapeDtypeStruct((B, 1), jnp.float32),
        in_specs=[pl.BlockSpec(memory_space=pltpu.MemorySpace.VMEM)] * 5,
        out_specs=pl.BlockSpec(memory_space=pltpu.MemorySpace.VMEM),
    )(X_encoded, y_prev, kp['w1_t'], kp['w_gate'], kp['vecs'])


# -----------------------------------------------------------------------------
# Pure-JAX reference that mirrors the PyTorch forward (for verification)
# -----------------------------------------------------------------------------
def decoder_ref(X, y_prev, p, D, E):
    B, Tm1, _ = X.shape
    d = jnp.zeros((B, D), jnp.float32)
    c = jnp.zeros((B, D), jnp.float32)
    ctx = jnp.zeros((B, E), jnp.float32)
    for t in range(Tm1):
        d_rep = jnp.broadcast_to(d[:, None, :], (B, Tm1, D))
        c_rep = jnp.broadcast_to(c[:, None, :], (B, Tm1, D))
        x = jnp.concatenate([d_rep, c_rep, X], axis=2).reshape(-1, 2 * D + E)
        h = jnp.tanh(x @ p['W1'].T + p['b1'])
        s = (h @ p['W2'].T + p['b2']).reshape(B, Tm1)
        beta = jax.nn.softmax(s, axis=1)
        ctx = jnp.einsum('bt,bte->be', beta, X)
        y_tilde = (jnp.concatenate([ctx, y_prev[:, t:t + 1]], axis=1)
                   @ p['Wfc'].T + p['bfc'])
        gates = (y_tilde @ p['w_ih'].T + p['b_ih']
                 + d @ p['w_hh'].T + p['b_hh'])
        i_g = jax.nn.sigmoid(gates[:, :D])
        f_g = jax.nn.sigmoid(gates[:, D:2 * D])
        g_g = jnp.tanh(gates[:, 2 * D:3 * D])
        o_g = jax.nn.sigmoid(gates[:, 3 * D:4 * D])
        c = f_g * c + i_g * g_g
        d = o_g * jnp.tanh(c)
    return jnp.concatenate([d, ctx], axis=1) @ p['Wff'].T + p['bff']


if __name__ == "__main__":
    # Shapes consistent with the module: T=8 -> T-1=7 encoder timesteps,
    # batch=2, encoder_num_hidden=32, decoder_num_hidden=32.
    B, T, D, E = 2, 8, 32, 32
    Tm1 = T - 1

    key = jax.random.PRNGKey(0)
    k_x, k_y, k_p = jax.random.split(key, 3)
    X_encoded = jax.random.normal(k_x, (B, Tm1, E), jnp.float32)
    y_prev = jax.random.normal(k_y, (B, Tm1), jnp.float32)

    params = init_params(k_p, T, D, E)
    kparams = to_kernel_params(params, D, E)

    fwd = jax.jit(decoder_forward)
    y_pred = jax.block_until_ready(fwd(X_encoded, y_prev, kparams))

    y_ref = decoder_ref(X_encoded, y_prev, params, D, E)
    assert y_pred.shape == (B, 1)
    assert bool(jnp.all(jnp.isfinite(y_pred)))
    # approx reciprocal in the softmax -> ~1e-3 relative drift over 7 steps.
    assert jnp.allclose(y_pred, y_ref, atol=1e-2, rtol=1e-2), (y_pred, y_ref)

    print("KERNEL_OK")
</pallas_src>

<mosaic_0001>
module attributes {stable_mosaic.version = 11 : i64} {
  func.func @decoder_kernel(%arg0: memref<2x7x32xf32, #tpu.memory_space<vmem>>, %arg1: memref<2x7xf32, #tpu.memory_space<vmem>>, %arg2: memref<96x32xf32, #tpu.memory_space<vmem>>, %arg3: memref<64x128xf32, #tpu.memory_space<vmem>>, %arg4: memref<8x128xf32, #tpu.memory_space<vmem>>, %arg5: memref<2x1xf32, #tpu.memory_space<vmem>>) attributes {dimension_semantics = [], scalar_prefetch = 0 : i64, scratch_operands = 0 : i64, tpu.core_type = #tpu.core_type<tc>} {
    %c0 = arith.constant 0 : index
    %c0_0 = arith.constant 0 : index
    %c0_1 = arith.constant 0 : index
    %0 = vector.load %arg0[%c0, %c0_0, %c0_1] : memref<2x7x32xf32, #tpu.memory_space<vmem>>, vector<2x7x32xf32>
    %c0_2 = arith.constant 0 : index
    %c0_3 = arith.constant 0 : index
    %1 = vector.load %arg2[%c0_2, %c0_3] : memref<96x32xf32, #tpu.memory_space<vmem>>, vector<64x32xf32>
    %c64 = arith.constant 64 : index
    %c0_4 = arith.constant 0 : index
    %2 = vector.load %arg2[%c64, %c0_4] : memref<96x32xf32, #tpu.memory_space<vmem>>, vector<32x32xf32>
    %c0_5 = arith.constant 0 : index
    %c0_6 = arith.constant 0 : index
    %3 = vector.load %arg3[%c0_5, %c0_6] : memref<64x128xf32, #tpu.memory_space<vmem>>, vector<64x128xf32>
    %c0_7 = arith.constant 0 : index
    %c0_8 = arith.constant 0 : index
    %4 = vector.load %arg4[%c0_7, %c0_8] : memref<8x128xf32, #tpu.memory_space<vmem>>, vector<8x128xf32>
    %5 = vector.extract_strided_slice %4 {offsets = [0, 0], sizes = [1, 32], strides = [1, 1]} : vector<8x128xf32> to vector<1x32xf32>
    %6 = vector.extract_strided_slice %4 {offsets = [1, 0], sizes = [1, 32], strides = [1, 1]} : vector<8x128xf32> to vector<1x32xf32>
    %7 = vector.extract_strided_slice %4 {offsets = [2, 0], sizes = [1, 32], strides = [1, 1]} : vector<8x128xf32> to vector<1x32xf32>
    %8 = vector.extract_strided_slice %4 {offsets = [3, 0], sizes = [1, 32], strides = [1, 1]} : vector<8x128xf32> to vector<1x32xf32>
    %9 = vector.extract_strided_slice %4 {offsets = [4, 0], sizes = [1, 1], strides = [1, 1]} : vector<8x128xf32> to vector<1x1xf32>
    %10 = vector.extract_strided_slice %4 {offsets = [5, 0], sizes = [1, 128], strides = [1, 1]} : vector<8x128xf32> to vector<1x128xf32>
    %11 = vector.extract_strided_slice %4 {offsets = [6, 0], sizes = [1, 128], strides = [1, 1]} : vector<8x128xf32> to vector<1x128xf32>
    %c0_9 = arith.constant 0 : index
    %c0_10 = arith.constant 0 : index
    %12 = vector.load %arg1[%c0_9, %c0_10] : memref<2x7xf32, #tpu.memory_space<vmem>>, vector<2x7xf32>
    %13 = vector.extract_strided_slice %0 {offsets = [0, 0, 0], sizes = [1, 7, 32], strides = [1, 1, 1]} : vector<2x7x32xf32> to vector<1x7x32xf32>
    %14 = vector.shape_cast %13 : vector<1x7x32xf32> to vector<7x32xf32>
    %cst = arith.constant dense<0.000000e+00> : vector<7x32xf32>
    %15 = tpu.matmul %14, %2, %cst {dimension_numbers = #tpu.dot_dimension_numbers<[1], [0], [0], [1], [0, 0, 1, 1], [], []>} : vector<7x32xf32>, vector<32x32xf32>, vector<7x32xf32> -> vector<7x32xf32>
    %16 = vector.shape_cast %15 : vector<7x32xf32> to vector<1x7x32xf32>
    %17 = vector.extract_strided_slice %0 {offsets = [1, 0, 0], sizes = [1, 7, 32], strides = [1, 1, 1]} : vector<2x7x32xf32> to vector<1x7x32xf32>
    %18 = vector.shape_cast %17 : vector<1x7x32xf32> to vector<7x32xf32>
    %cst_11 = arith.constant dense<0.000000e+00> : vector<7x32xf32>
    %19 = tpu.matmul %18, %2, %cst_11 {dimension_numbers = #tpu.dot_dimension_numbers<[1], [0], [0], [1], [0, 0, 1, 1], [], []>} : vector<7x32xf32>, vector<32x32xf32>, vector<7x32xf32> -> vector<7x32xf32>
    %20 = vector.shape_cast %19 : vector<7x32xf32> to vector<1x7x32xf32>
    %21 = tpu.concatenate %16, %20 in 0 : vector<1x7x32xf32>, vector<1x7x32xf32> -> vector<2x7x32xf32>
    %22 = vector.shape_cast %5 : vector<1x32xf32> to vector<1x1x32xf32>
    %23 = vector.broadcast %22 : vector<1x1x32xf32> to vector<2x7x32xf32>
    %24 = arith.addf %21, %23 : vector<2x7x32xf32>
    %25 = vector.shape_cast %6 : vector<1x32xf32> to vector<1x1x32xf32>
    %26 = vector.shape_cast %25 : vector<1x1x32xf32> to vector<1x1x32xf32>
    %27 = vector.broadcast %26 : vector<1x1x32xf32> to vector<2x7x32xf32>
    %cst_12 = arith.constant 0.000000e+00 : f32
    %28 = vector.broadcast %cst_12 : f32 to vector<2x32xf32>
    %cst_13 = arith.constant 0.000000e+00 : f32
    %29 = vector.broadcast %cst_13 : f32 to vector<2x32xf32>
    %30 = tpu.concatenate %28, %29 in 1 : vector<2x32xf32>, vector<2x32xf32> -> vector<2x64xf32>
    %cst_14 = arith.constant dense<0.000000e+00> : vector<2x32xf32>
    %31 = tpu.matmul %30, %1, %cst_14 {dimension_numbers = #tpu.dot_dimension_numbers<[1], [0], [0], [1], [0, 0, 1, 1], [], []>} : vector<2x64xf32>, vector<64x32xf32>, vector<2x32xf32> -> vector<2x32xf32>
    %32 = vector.shape_cast %31 : vector<2x32xf32> to vector<2x1x32xf32>
    %33 = vector.broadcast %32 : vector<2x1x32xf32> to vector<2x7x32xf32>
    %34 = arith.addf %24, %33 : vector<2x7x32xf32>
    %35 = math.tanh %34 : vector<2x7x32xf32>
    %36 = arith.mulf %35, %27 : vector<2x7x32xf32>
    %cst_15 = arith.constant dense<0.000000e+00> : vector<2x7xf32>
    %37 = vector.multi_reduction <add>, %36, %cst_15 [2] : vector<2x7x32xf32> to vector<2x7xf32>
    %38 = math.exp %37 : vector<2x7xf32>
    %cst_16 = arith.constant dense<0.000000e+00> : vector<2xf32>
    %39 = vector.multi_reduction <add>, %38, %cst_16 [1] : vector<2x7xf32> to vector<2xf32>
    %40 = vector.shape_cast %39 : vector<2xf32> to vector<2x1xf32>
    %41 = tpu.reciprocal %40 {approx = true} : vector<2x1xf32> -> vector<2x1xf32>
    %42 = vector.broadcast %41 : vector<2x1xf32> to vector<2x7xf32>
    %43 = arith.mulf %38, %42 : vector<2x7xf32>
    %44 = vector.shape_cast %43 : vector<2x7xf32> to vector<2x7x1xf32>
    %45 = vector.broadcast %44 : vector<2x7x1xf32> to vector<2x7x32xf32>
    %46 = arith.mulf %45, %0 : vector<2x7x32xf32>
    %cst_17 = arith.constant dense<0.000000e+00> : vector<2x32xf32>
    %47 = vector.multi_reduction <add>, %46, %cst_17 [1] : vector<2x7x32xf32> to vector<2x32xf32>
    %48 = vector.extract_strided_slice %12 {offsets = [0, 0], sizes = [2, 1], strides = [1, 1]} : vector<2x7xf32> to vector<2x1xf32>
    %49 = vector.broadcast %48 : vector<2x1xf32> to vector<2x128xf32>
    %50 = vector.broadcast %10 : vector<1x128xf32> to vector<2x128xf32>
    %51 = arith.mulf %49, %50 : vector<2x128xf32>
    %52 = vector.broadcast %11 : vector<1x128xf32> to vector<2x128xf32>
    %53 = arith.addf %51, %52 : vector<2x128xf32>
    %54 = tpu.concatenate %28, %47 in 1 : vector<2x32xf32>, vector<2x32xf32> -> vector<2x64xf32>
    %cst_18 = arith.constant dense<0.000000e+00> : vector<2x128xf32>
    %55 = tpu.matmul %54, %3, %cst_18 {dimension_numbers = #tpu.dot_dimension_numbers<[1], [0], [0], [1], [0, 0, 1, 1], [], []>} : vector<2x64xf32>, vector<64x128xf32>, vector<2x128xf32> -> vector<2x128xf32>
    %56 = arith.addf %55, %53 : vector<2x128xf32>
    %cst_19 = arith.constant 5.000000e-01 : f32
    %57 = vector.broadcast %cst_19 : f32 to vector<2x128xf32>
    %58 = arith.mulf %57, %56 : vector<2x128xf32>
    %59 = math.tanh %58 : vector<2x128xf32>
    %cst_20 = arith.constant 5.000000e-01 : f32
    %60 = vector.broadcast %cst_20 : f32 to vector<2x128xf32>
    %61 = arith.mulf %60, %59 : vector<2x128xf32>
    %cst_21 = arith.constant 5.000000e-01 : f32
    %62 = vector.broadcast %cst_21 : f32 to vector<2x128xf32>
    %63 = arith.addf %61, %62 : vector<2x128xf32>
    %64 = math.tanh %56 : vector<2x128xf32>
    %65 = vector.extract_strided_slice %63 {offsets = [0, 0], sizes = [2, 32], strides = [1, 1]} : vector<2x128xf32> to vector<2x32xf32>
    %66 = vector.extract_strided_slice %63 {offsets = [0, 32], sizes = [2, 32], strides = [1, 1]} : vector<2x128xf32> to vector<2x32xf32>
    %67 = vector.extract_strided_slice %64 {offsets = [0, 64], sizes = [2, 32], strides = [1, 1]} : vector<2x128xf32> to vector<2x32xf32>
    %68 = vector.extract_strided_slice %63 {offsets = [0, 96], sizes = [2, 32], strides = [1, 1]} : vector<2x128xf32> to vector<2x32xf32>
    %69 = arith.mulf %66, %29 : vector<2x32xf32>
    %70 = arith.mulf %65, %67 : vector<2x32xf32>
    %71 = arith.addf %69, %70 : vector<2x32xf32>
    %72 = math.tanh %71 : vector<2x32xf32>
    %73 = arith.mulf %68, %72 : vector<2x32xf32>
    %74 = tpu.concatenate %73, %71 in 1 : vector<2x32xf32>, vector<2x32xf32> -> vector<2x64xf32>
    %cst_22 = arith.constant dense<0.000000e+00> : vector<2x32xf32>
    %75 = tpu.matmul %74, %1, %cst_22 {dimension_numbers = #tpu.dot_dimension_numbers<[1], [0], [0], [1], [0, 0, 1, 1], [], []>} : vector<2x64xf32>, vector<64x32xf32>, vector<2x32xf32> -> vector<2x32xf32>
    %76 = vector.shape_cast %75 : vector<2x32xf32> to vector<2x1x32xf32>
    %77 = vector.broadcast %76 : vector<2x1x32xf32> to vector<2x7x32xf32>
    %78 = arith.addf %24, %77 : vector<2x7x32xf32>
    %79 = math.tanh %78 : vector<2x7x32xf32>
    %80 = arith.mulf %79, %27 : vector<2x7x32xf32>
    %cst_23 = arith.constant dense<0.000000e+00> : vector<2x7xf32>
    %81 = vector.multi_reduction <add>, %80, %cst_23 [2] : vector<2x7x32xf32> to vector<2x7xf32>
    %82 = math.exp %81 : vector<2x7xf32>
    %cst_24 = arith.constant dense<0.000000e+00> : vector<2xf32>
    %83 = vector.multi_reduction <add>, %82, %cst_24 [1] : vector<2x7xf32> to vector<2xf32>
    %84 = vector.shape_cast %83 : vector<2xf32> to vector<2x1xf32>
    %85 = tpu.reciprocal %84 {approx = true} : vector<2x1xf32> -> vector<2x1xf32>
    %86 = vector.broadcast %85 : vector<2x1xf32> to vector<2x7xf32>
    %87 = arith.mulf %82, %86 : vector<2x7xf32>
    %88 = vector.shape_cast %87 : vector<2x7xf32> to vector<2x7x1xf32>
    %89 = vector.broadcast %88 : vector<2x7x1xf32> to vector<2x7x32xf32>
    %90 = arith.mulf %89, %0 : vector<2x7x32xf32>
    %cst_25 = arith.constant dense<0.000000e+00> : vector<2x32xf32>
    %91 = vector.multi_reduction <add>, %90, %cst_25 [1] : vector<2x7x32xf32> to vector<2x32xf32>
    %92 = vector.extract_strided_slice %12 {offsets = [0, 1], sizes = [2, 1], strides = [1, 1]} : vector<2x7xf32> to vector<2x1xf32>
    %93 = vector.broadcast %92 : vector<2x1xf32> to vector<2x128xf32>
    %94 = vector.broadcast %10 : vector<1x128xf32> to vector<2x128xf32>
    %95 = arith.mulf %93, %94 : vector<2x128xf32>
    %96 = vector.broadcast %11 : vector<1x128xf32> to vector<2x128xf32>
    %97 = arith.addf %95, %96 : vector<2x128xf32>
    %98 = tpu.concatenate %73, %91 in 1 : vector<2x32xf32>, vector<2x32xf32> -> vector<2x64xf32>
    %cst_26 = arith.constant dense<0.000000e+00> : vector<2x128xf32>
    %99 = tpu.matmul %98, %3, %cst_26 {dimension_numbers = #tpu.dot_dimension_numbers<[1], [0], [0], [1], [0, 0, 1, 1], [], []>} : vector<2x64xf32>, vector<64x128xf32>, vector<2x128xf32> -> vector<2x128xf32>
    %100 = arith.addf %99, %97 : vector<2x128xf32>
    %cst_27 = arith.constant 5.000000e-01 : f32
    %101 = vector.broadcast %cst_27 : f32 to vector<2x128xf32>
    %102 = arith.mulf %101, %100 : vector<2x128xf32>
    %103 = math.tanh %102 : vector<2x128xf32>
    %cst_28 = arith.constant 5.000000e-01 : f32
    %104 = vector.broadcast %cst_28 : f32 to vector<2x128xf32>
    %105 = arith.mulf %104, %103 : vector<2x128xf32>
    %cst_29 = arith.constant 5.000000e-01 : f32
    %106 = vector.broadcast %cst_29 : f32 to vector<2x128xf32>
    %107 = arith.addf %105, %106 : vector<2x128xf32>
    %108 = math.tanh %100 : vector<2x128xf32>
    %109 = vector.extract_strided_slice %107 {offsets = [0, 0], sizes = [2, 32], strides = [1, 1]} : vector<2x128xf32> to vector<2x32xf32>
    %110 = vector.extract_strided_slice %107 {offsets = [0, 32], sizes = [2, 32], strides = [1, 1]} : vector<2x128xf32> to vector<2x32xf32>
    %111 = vector.extract_strided_slice %108 {offsets = [0, 64], sizes = [2, 32], strides = [1, 1]} : vector<2x128xf32> to vector<2x32xf32>
    %112 = vector.extract_strided_slice %107 {offsets = [0, 96], sizes = [2, 32], strides = [1, 1]} : vector<2x128xf32> to vector<2x32xf32>
    %113 = arith.mulf %110, %71 : vector<2x32xf32>
    %114 = arith.mulf %109, %111 : vector<2x32xf32>
    %115 = arith.addf %113, %114 : vector<2x32xf32>
    %116 = math.tanh %115 : vector<2x32xf32>
    %117 = arith.mulf %112, %116 : vector<2x32xf32>
    %118 = tpu.concatenate %117, %115 in 1 : vector<2x32xf32>, vector<2x32xf32> -> vector<2x64xf32>
    %cst_30 = arith.constant dense<0.000000e+00> : vector<2x32xf32>
    %119 = tpu.matmul %118, %1, %cst_30 {dimension_numbers = #tpu.dot_dimension_numbers<[1], [0], [0], [1], [0, 0, 1, 1], [], []>} : vector<2x64xf32>, vector<64x32xf32>, vector<2x32xf32> -> vector<2x32xf32>
    %120 = vector.shape_cast %119 : vector<2x32xf32> to vector<2x1x32xf32>
    %121 = vector.broadcast %120 : vector<2x1x32xf32> to vector<2x7x32xf32>
    %122 = arith.addf %24, %121 : vector<2x7x32xf32>
    %123 = math.tanh %122 : vector<2x7x32xf32>
    %124 = arith.mulf %123, %27 : vector<2x7x32xf32>
    %cst_31 = arith.constant dense<0.000000e+00> : vector<2x7xf32>
    %125 = vector.multi_reduction <add>, %124, %cst_31 [2] : vector<2x7x32xf32> to vector<2x7xf32>
    %126 = math.exp %125 : vector<2x7xf32>
    %cst_32 = arith.constant dense<0.000000e+00> : vector<2xf32>
    %127 = vector.multi_reduction <add>, %126, %cst_32 [1] : vector<2x7xf32> to vector<2xf32>
    %128 = vector.shape_cast %127 : vector<2xf32> to vector<2x1xf32>
    %129 = tpu.reciprocal %128 {approx = true} : vector<2x1xf32> -> vector<2x1xf32>
    %130 = vector.broadcast %129 : vector<2x1xf32> to vector<2x7xf32>
    %131 = arith.mulf %126, %130 : vector<2x7xf32>
    %132 = vector.shape_cast %131 : vector<2x7xf32> to vector<2x7x1xf32>
    %133 = vector.broadcast %132 : vector<2x7x1xf32> to vector<2x7x32xf32>
    %134 = arith.mulf %133, %0 : vector<2x7x32xf32>
    %cst_33 = arith.constant dense<0.000000e+00> : vector<2x32xf32>
    %135 = vector.multi_reduction <add>, %134, %cst_33 [1] : vector<2x7x32xf32> to vector<2x32xf32>
    %136 = vector.extract_strided_slice %12 {offsets = [0, 2], sizes = [2, 1], strides = [1, 1]} : vector<2x7xf32> to vector<2x1xf32>
    %137 = vector.broadcast %136 : vector<2x1xf32> to vector<2x128xf32>
    %138 = vector.broadcast %10 : vector<1x128xf32> to vector<2x128xf32>
    %139 = arith.mulf %137, %138 : vector<2x128xf32>
    %140 = vector.broadcast %11 : vector<1x128xf32> to vector<2x128xf32>
    %141 = arith.addf %139, %140 : vector<2x128xf32>
    %142 = tpu.concatenate %117, %135 in 1 : vector<2x32xf32>, vector<2x32xf32> -> vector<2x64xf32>
    %cst_34 = arith.constant dense<0.000000e+00> : vector<2x128xf32>
    %143 = tpu.matmul %142, %3, %cst_34 {dimension_numbers = #tpu.dot_dimension_numbers<[1], [0], [0], [1], [0, 0, 1, 1], [], []>} : vector<2x64xf32>, vector<64x128xf32>, vector<2x128xf32> -> vector<2x128xf32>
    %144 = arith.addf %143, %141 : vector<2x128xf32>
    %cst_35 = arith.constant 5.000000e-01 : f32
    %145 = vector.broadcast %cst_35 : f32 to vector<2x128xf32>
    %146 = arith.mulf %145, %144 : vector<2x128xf32>
    %147 = math.tanh %146 : vector<2x128xf32>
    %cst_36 = arith.constant 5.000000e-01 : f32
    %148 = vector.broadcast %cst_36 : f32 to vector<2x128xf32>
    %149 = arith.mulf %148, %147 : vector<2x128xf32>
    %cst_37 = arith.constant 5.000000e-01 : f32
    %150 = vector.broadcast %cst_37 : f32 to vector<2x128xf32>
    %151 = arith.addf %149, %150 : vector<2x128xf32>
    %152 = math.tanh %144 : vector<2x128xf32>
    %153 = vector.extract_strided_slice %151 {offsets = [0, 0], sizes = [2, 32], strides = [1, 1]} : vector<2x128xf32> to vector<2x32xf32>
    %154 = vector.extract_strided_slice %151 {offsets = [0, 32], sizes = [2, 32], strides = [1, 1]} : vector<2x128xf32> to vector<2x32xf32>
    %155 = vector.extract_strided_slice %152 {offsets = [0, 64], sizes = [2, 32], strides = [1, 1]} : vector<2x128xf32> to vector<2x32xf32>
    %156 = vector.extract_strided_slice %151 {offsets = [0, 96], sizes = [2, 32], strides = [1, 1]} : vector<2x128xf32> to vector<2x32xf32>
    %157 = arith.mulf %154, %115 : vector<2x32xf32>
    %158 = arith.mulf %153, %155 : vector<2x32xf32>
    %159 = arith.addf %157, %158 : vector<2x32xf32>
    %160 = math.tanh %159 : vector<2x32xf32>
    %161 = arith.mulf %156, %160 : vector<2x32xf32>
    %162 = tpu.concatenate %161, %159 in 1 : vector<2x32xf32>, vector<2x32xf32> -> vector<2x64xf32>
    %cst_38 = arith.constant dense<0.000000e+00> : vector<2x32xf32>
    %163 = tpu.matmul %162, %1, %cst_38 {dimension_numbers = #tpu.dot_dimension_numbers<[1], [0], [0], [1], [0, 0, 1, 1], [], []>} : vector<2x64xf32>, vector<64x32xf32>, vector<2x32xf32> -> vector<2x32xf32>
    %164 = vector.shape_cast %163 : vector<2x32xf32> to vector<2x1x32xf32>
    %165 = vector.broadcast %164 : vector<2x1x32xf32> to vector<2x7x32xf32>
    %166 = arith.addf %24, %165 : vector<2x7x32xf32>
    %167 = math.tanh %166 : vector<2x7x32xf32>
    %168 = arith.mulf %167, %27 : vector<2x7x32xf32>
    %cst_39 = arith.constant dense<0.000000e+00> : vector<2x7xf32>
    %169 = vector.multi_reduction <add>, %168, %cst_39 [2] : vector<2x7x32xf32> to vector<2x7xf32>
    %170 = math.exp %169 : vector<2x7xf32>
    %cst_40 = arith.constant dense<0.000000e+00> : vector<2xf32>
    %171 = vector.multi_reduction <add>, %170, %cst_40 [1] : vector<2x7xf32> to vector<2xf32>
    %172 = vector.shape_cast %171 : vector<2xf32> to vector<2x1xf32>
    %173 = tpu.reciprocal %172 {approx = true} : vector<2x1xf32> -> vector<2x1xf32>
    %174 = vector.broadcast %173 : vector<2x1xf32> to vector<2x7xf32>
    %175 = arith.mulf %170, %174 : vector<2x7xf32>
    %176 = vector.shape_cast %175 : vector<2x7xf32> to vector<2x7x1xf32>
    %177 = vector.broadcast %176 : vector<2x7x1xf32> to vector<2x7x32xf32>
    %178 = arith.mulf %177, %0 : vector<2x7x32xf32>
    %cst_41 = arith.constant dense<0.000000e+00> : vector<2x32xf32>
    %179 = vector.multi_reduction <add>, %178, %cst_41 [1] : vector<2x7x32xf32> to vector<2x32xf32>
    %180 = vector.extract_strided_slice %12 {offsets = [0, 3], sizes = [2, 1], strides = [1, 1]} : vector<2x7xf32> to vector<2x1xf32>
    %181 = vector.broadcast %180 : vector<2x1xf32> to vector<2x128xf32>
    %182 = vector.broadcast %10 : vector<1x128xf32> to vector<2x128xf32>
    %183 = arith.mulf %181, %182 : vector<2x128xf32>
    %184 = vector.broadcast %11 : vector<1x128xf32> to vector<2x128xf32>
    %185 = arith.addf %183, %184 : vector<2x128xf32>
    %186 = tpu.concatenate %161, %179 in 1 : vector<2x32xf32>, vector<2x32xf32> -> vector<2x64xf32>
    %cst_42 = arith.constant dense<0.000000e+00> : vector<2x128xf32>
    %187 = tpu.matmul %186, %3, %cst_42 {dimension_numbers = #tpu.dot_dimension_numbers<[1], [0], [0], [1], [0, 0, 1, 1], [], []>} : vector<2x64xf32>, vector<64x128xf32>, vector<2x128xf32> -> vector<2x128xf32>
    %188 = arith.addf %187, %185 : vector<2x128xf32>
    %cst_43 = arith.constant 5.000000e-01 : f32
    %189 = vector.broadcast %cst_43 : f32 to vector<2x128xf32>
    %190 = arith.mulf %189, %188 : vector<2x128xf32>
    %191 = math.tanh %190 : vector<2x128xf32>
    %cst_44 = arith.constant 5.000000e-01 : f32
    %192 = vector.broadcast %cst_44 : f32 to vector<2x128xf32>
    %193 = arith.mulf %192, %191 : vector<2x128xf32>
    %cst_45 = arith.constant 5.000000e-01 : f32
    %194 = vector.broadcast %cst_45 : f32 to vector<2x128xf32>
    %195 = arith.addf %193, %194 : vector<2x128xf32>
    %196 = math.tanh %188 : vector<2x128xf32>
    %197 = vector.extract_strided_slice %195 {offsets = [0, 0], sizes = [2, 32], strides = [1, 1]} : vector<2x128xf32> to vector<2x32xf32>
    %198 = vector.extract_strided_slice %195 {offsets = [0, 32], sizes = [2, 32], strides = [1, 1]} : vector<2x128xf32> to vector<2x32xf32>
    %199 = vector.extract_strided_slice %196 {offsets = [0, 64], sizes = [2, 32], strides = [1, 1]} : vector<2x128xf32> to vector<2x32xf32>
    %200 = vector.extract_strided_slice %195 {offsets = [0, 96], sizes = [2, 32], strides = [1, 1]} : vector<2x128xf32> to vector<2x32xf32>
    %201 = arith.mulf %198, %159 : vector<2x32xf32>
    %202 = arith.mulf %197, %199 : vector<2x32xf32>
    %203 = arith.addf %201, %202 : vector<2x32xf32>
    %204 = math.tanh %203 : vector<2x32xf32>
    %205 = arith.mulf %200, %204 : vector<2x32xf32>
    %206 = tpu.concatenate %205, %203 in 1 : vector<2x32xf32>, vector<2x32xf32> -> vector<2x64xf32>
    %cst_46 = arith.constant dense<0.000000e+00> : vector<2x32xf32>
    %207 = tpu.matmul %206, %1, %cst_46 {dimension_numbers = #tpu.dot_dimension_numbers<[1], [0], [0], [1], [0, 0, 1, 1], [], []>} : vector<2x64xf32>, vector<64x32xf32>, vector<2x32xf32> -> vector<2x32xf32>
    %208 = vector.shape_cast %207 : vector<2x32xf32> to vector<2x1x32xf32>
    %209 = vector.broadcast %208 : vector<2x1x32xf32> to vector<2x7x32xf32>
    %210 = arith.addf %24, %209 : vector<2x7x32xf32>
    %211 = math.tanh %210 : vector<2x7x32xf32>
    %212 = arith.mulf %211, %27 : vector<2x7x32xf32>
    %cst_47 = arith.constant dense<0.000000e+00> : vector<2x7xf32>
    %213 = vector.multi_reduction <add>, %212, %cst_47 [2] : vector<2x7x32xf32> to vector<2x7xf32>
    %214 = math.exp %213 : vector<2x7xf32>
    %cst_48 = arith.constant dense<0.000000e+00> : vector<2xf32>
    %215 = vector.multi_reduction <add>, %214, %cst_48 [1] : vector<2x7xf32> to vector<2xf32>
    %216 = vector.shape_cast %215 : vector<2xf32> to vector<2x1xf32>
    %217 = tpu.reciprocal %216 {approx = true} : vector<2x1xf32> -> vector<2x1xf32>
    %218 = vector.broadcast %217 : vector<2x1xf32> to vector<2x7xf32>
    %219 = arith.mulf %214, %218 : vector<2x7xf32>
    %220 = vector.shape_cast %219 : vector<2x7xf32> to vector<2x7x1xf32>
    %221 = vector.broadcast %220 : vector<2x7x1xf32> to vector<2x7x32xf32>
    %222 = arith.mulf %221, %0 : vector<2x7x32xf32>
    %cst_49 = arith.constant dense<0.000000e+00> : vector<2x32xf32>
    %223 = vector.multi_reduction <add>, %222, %cst_49 [1] : vector<2x7x32xf32> to vector<2x32xf32>
    %224 = vector.extract_strided_slice %12 {offsets = [0, 4], sizes = [2, 1], strides = [1, 1]} : vector<2x7xf32> to vector<2x1xf32>
    %225 = vector.broadcast %224 : vector<2x1xf32> to vector<2x128xf32>
    %226 = vector.broadcast %10 : vector<1x128xf32> to vector<2x128xf32>
    %227 = arith.mulf %225, %226 : vector<2x128xf32>
    %228 = vector.broadcast %11 : vector<1x128xf32> to vector<2x128xf32>
    %229 = arith.addf %227, %228 : vector<2x128xf32>
    %230 = tpu.concatenate %205, %223 in 1 : vector<2x32xf32>, vector<2x32xf32> -> vector<2x64xf32>
    %cst_50 = arith.constant dense<0.000000e+00> : vector<2x128xf32>
    %231 = tpu.matmul %230, %3, %cst_50 {dimension_numbers = #tpu.dot_dimension_numbers<[1], [0], [0], [1], [0, 0, 1, 1], [], []>} : vector<2x64xf32>, vector<64x128xf32>, vector<2x128xf32> -> vector<2x128xf32>
    %232 = arith.addf %231, %229 : vector<2x128xf32>
    %cst_51 = arith.constant 5.000000e-01 : f32
    %233 = vector.broadcast %cst_51 : f32 to vector<2x128xf32>
    %234 = arith.mulf %233, %232 : vector<2x128xf32>
    %235 = math.tanh %234 : vector<2x128xf32>
    %cst_52 = arith.constant 5.000000e-01 : f32
    %236 = vector.broadcast %cst_52 : f32 to vector<2x128xf32>
    %237 = arith.mulf %236, %235 : vector<2x128xf32>
    %cst_53 = arith.constant 5.000000e-01 : f32
    %238 = vector.broadcast %cst_53 : f32 to vector<2x128xf32>
    %239 = arith.addf %237, %238 : vector<2x128xf32>
    %240 = math.tanh %232 : vector<2x128xf32>
    %241 = vector.extract_strided_slice %239 {offsets = [0, 0], sizes = [2, 32], strides = [1, 1]} : vector<2x128xf32> to vector<2x32xf32>
    %242 = vector.extract_strided_slice %239 {offsets = [0, 32], sizes = [2, 32], strides = [1, 1]} : vector<2x128xf32> to vector<2x32xf32>
    %243 = vector.extract_strided_slice %240 {offsets = [0, 64], sizes = [2, 32], strides = [1, 1]} : vector<2x128xf32> to vector<2x32xf32>
    %244 = vector.extract_strided_slice %239 {offsets = [0, 96], sizes = [2, 32], strides = [1, 1]} : vector<2x128xf32> to vector<2x32xf32>
    %245 = arith.mulf %242, %203 : vector<2x32xf32>
    %246 = arith.mulf %241, %243 : vector<2x32xf32>
    %247 = arith.addf %245, %246 : vector<2x32xf32>
    %248 = math.tanh %247 : vector<2x32xf32>
    %249 = arith.mulf %244, %248 : vector<2x32xf32>
    %250 = tpu.concatenate %249, %247 in 1 : vector<2x32xf32>, vector<2x32xf32> -> vector<2x64xf32>
    %cst_54 = arith.constant dense<0.000000e+00> : vector<2x32xf32>
    %251 = tpu.matmul %250, %1, %cst_54 {dimension_numbers = #tpu.dot_dimension_numbers<[1], [0], [0], [1], [0, 0, 1, 1], [], []>} : vector<2x64xf32>, vector<64x32xf32>, vector<2x32xf32> -> vector<2x32xf32>
    %252 = vector.shape_cast %251 : vector<2x32xf32> to vector<2x1x32xf32>
    %253 = vector.broadcast %252 : vector<2x1x32xf32> to vector<2x7x32xf32>
    %254 = arith.addf %24, %253 : vector<2x7x32xf32>
    %255 = math.tanh %254 : vector<2x7x32xf32>
    %256 = arith.mulf %255, %27 : vector<2x7x32xf32>
    %cst_55 = arith.constant dense<0.000000e+00> : vector<2x7xf32>
    %257 = vector.multi_reduction <add>, %256, %cst_55 [2] : vector<2x7x32xf32> to vector<2x7xf32>
    %258 = math.exp %257 : vector<2x7xf32>
    %cst_56 = arith.constant dense<0.000000e+00> : vector<2xf32>
    %259 = vector.multi_reduction <add>, %258, %cst_56 [1] : vector<2x7xf32> to vector<2xf32>
    %260 = vector.shape_cast %259 : vector<2xf32> to vector<2x1xf32>
    %261 = tpu.reciprocal %260 {approx = true} : vector<2x1xf32> -> vector<2x1xf32>
    %262 = vector.broadcast %261 : vector<2x1xf32> to vector<2x7xf32>
    %263 = arith.mulf %258, %262 : vector<2x7xf32>
    %264 = vector.shape_cast %263 : vector<2x7xf32> to vector<2x7x1xf32>
    %265 = vector.broadcast %264 : vector<2x7x1xf32> to vector<2x7x32xf32>
    %266 = arith.mulf %265, %0 : vector<2x7x32xf32>
    %cst_57 = arith.constant dense<0.000000e+00> : vector<2x32xf32>
    %267 = vector.multi_reduction <add>, %266, %cst_57 [1] : vector<2x7x32xf32> to vector<2x32xf32>
    %268 = vector.extract_strided_slice %12 {offsets = [0, 5], sizes = [2, 1], strides = [1, 1]} : vector<2x7xf32> to vector<2x1xf32>
    %269 = vector.broadcast %268 : vector<2x1xf32> to vector<2x128xf32>
    %270 = vector.broadcast %10 : vector<1x128xf32> to vector<2x128xf32>
    %271 = arith.mulf %269, %270 : vector<2x128xf32>
    %272 = vector.broadcast %11 : vector<1x128xf32> to vector<2x128xf32>
    %273 = arith.addf %271, %272 : vector<2x128xf32>
    %274 = tpu.concatenate %249, %267 in 1 : vector<2x32xf32>, vector<2x32xf32> -> vector<2x64xf32>
    %cst_58 = arith.constant dense<0.000000e+00> : vector<2x128xf32>
    %275 = tpu.matmul %274, %3, %cst_58 {dimension_numbers = #tpu.dot_dimension_numbers<[1], [0], [0], [1], [0, 0, 1, 1], [], []>} : vector<2x64xf32>, vector<64x128xf32>, vector<2x128xf32> -> vector<2x128xf32>
    %276 = arith.addf %275, %273 : vector<2x128xf32>
    %cst_59 = arith.constant 5.000000e-01 : f32
    %277 = vector.broadcast %cst_59 : f32 to vector<2x128xf32>
    %278 = arith.mulf %277, %276 : vector<2x128xf32>
    %279 = math.tanh %278 : vector<2x128xf32>
    %cst_60 = arith.constant 5.000000e-01 : f32
    %280 = vector.broadcast %cst_60 : f32 to vector<2x128xf32>
    %281 = arith.mulf %280, %279 : vector<2x128xf32>
    %cst_61 = arith.constant 5.000000e-01 : f32
    %282 = vector.broadcast %cst_61 : f32 to vector<2x128xf32>
    %283 = arith.addf %281, %282 : vector<2x128xf32>
    %284 = math.tanh %276 : vector<2x128xf32>
    %285 = vector.extract_strided_slice %283 {offsets = [0, 0], sizes = [2, 32], strides = [1, 1]} : vector<2x128xf32> to vector<2x32xf32>
    %286 = vector.extract_strided_slice %283 {offsets = [0, 32], sizes = [2, 32], strides = [1, 1]} : vector<2x128xf32> to vector<2x32xf32>
    %287 = vector.extract_strided_slice %284 {offsets = [0, 64], sizes = [2, 32], strides = [1, 1]} : vector<2x128xf32> to vector<2x32xf32>
    %288 = vector.extract_strided_slice %283 {offsets = [0, 96], sizes = [2, 32], strides = [1, 1]} : vector<2x128xf32> to vector<2x32xf32>
    %289 = arith.mulf %286, %247 : vector<2x32xf32>
    %290 = arith.mulf %285, %287 : vector<2x32xf32>
    %291 = arith.addf %289, %290 : vector<2x32xf32>
    %292 = math.tanh %291 : vector<2x32xf32>
    %293 = arith.mulf %288, %292 : vector<2x32xf32>
    %294 = tpu.concatenate %293, %291 in 1 : vector<2x32xf32>, vector<2x32xf32> -> vector<2x64xf32>
    %cst_62 = arith.constant dense<0.000000e+00> : vector<2x32xf32>
    %295 = tpu.matmul %294, %1, %cst_62 {dimension_numbers = #tpu.dot_dimension_numbers<[1], [0], [0], [1], [0, 0, 1, 1], [], []>} : vector<2x64xf32>, vector<64x32xf32>, vector<2x32xf32> -> vector<2x32xf32>
    %296 = vector.shape_cast %295 : vector<2x32xf32> to vector<2x1x32xf32>
    %297 = vector.broadcast %296 : vector<2x1x32xf32> to vector<2x7x32xf32>
    %298 = arith.addf %24, %297 : vector<2x7x32xf32>
    %299 = math.tanh %298 : vector<2x7x32xf32>
    %300 = arith.mulf %299, %27 : vector<2x7x32xf32>
    %cst_63 = arith.constant dense<0.000000e+00> : vector<2x7xf32>
    %301 = vector.multi_reduction <add>, %300, %cst_63 [2] : vector<2x7x32xf32> to vector<2x7xf32>
    %302 = math.exp %301 : vector<2x7xf32>
    %cst_64 = arith.constant dense<0.000000e+00> : vector<2xf32>
    %303 = vector.multi_reduction <add>, %302, %cst_64 [1] : vector<2x7xf32> to vector<2xf32>
    %304 = vector.shape_cast %303 : vector<2xf32> to vector<2x1xf32>
    %305 = tpu.reciprocal %304 {approx = true} : vector<2x1xf32> -> vector<2x1xf32>
    %306 = vector.broadcast %305 : vector<2x1xf32> to vector<2x7xf32>
    %307 = arith.mulf %302, %306 : vector<2x7xf32>
    %308 = vector.shape_cast %307 : vector<2x7xf32> to vector<2x7x1xf32>
    %309 = vector.broadcast %308 : vector<2x7x1xf32> to vector<2x7x32xf32>
    %310 = arith.mulf %309, %0 : vector<2x7x32xf32>
    %cst_65 = arith.constant dense<0.000000e+00> : vector<2x32xf32>
    %311 = vector.multi_reduction <add>, %310, %cst_65 [1] : vector<2x7x32xf32> to vector<2x32xf32>
    %312 = vector.extract_strided_slice %12 {offsets = [0, 6], sizes = [2, 1], strides = [1, 1]} : vector<2x7xf32> to vector<2x1xf32>
    %313 = vector.broadcast %312 : vector<2x1xf32> to vector<2x128xf32>
    %314 = vector.broadcast %10 : vector<1x128xf32> to vector<2x128xf32>
    %315 = arith.mulf %313, %314 : vector<2x128xf32>
    %316 = vector.broadcast %11 : vector<1x128xf32> to vector<2x128xf32>
    %317 = arith.addf %315, %316 : vector<2x128xf32>
    %318 = tpu.concatenate %293, %311 in 1 : vector<2x32xf32>, vector<2x32xf32> -> vector<2x64xf32>
    %cst_66 = arith.constant dense<0.000000e+00> : vector<2x128xf32>
    %319 = tpu.matmul %318, %3, %cst_66 {dimension_numbers = #tpu.dot_dimension_numbers<[1], [0], [0], [1], [0, 0, 1, 1], [], []>} : vector<2x64xf32>, vector<64x128xf32>, vector<2x128xf32> -> vector<2x128xf32>
    %320 = arith.addf %319, %317 : vector<2x128xf32>
    %cst_67 = arith.constant 5.000000e-01 : f32
    %321 = vector.broadcast %cst_67 : f32 to vector<2x128xf32>
    %322 = arith.mulf %321, %320 : vector<2x128xf32>
    %323 = math.tanh %322 : vector<2x128xf32>
    %cst_68 = arith.constant 5.000000e-01 : f32
    %324 = vector.broadcast %cst_68 : f32 to vector<2x128xf32>
    %325 = arith.mulf %324, %323 : vector<2x128xf32>
    %cst_69 = arith.constant 5.000000e-01 : f32
    %326 = vector.broadcast %cst_69 : f32 to vector<2x128xf32>
    %327 = arith.addf %325, %326 : vector<2x128xf32>
    %328 = math.tanh %320 : vector<2x128xf32>
    %329 = vector.extract_strided_slice %327 {offsets = [0, 0], sizes = [2, 32], strides = [1, 1]} : vector<2x128xf32> to vector<2x32xf32>
    %330 = vector.extract_strided_slice %327 {offsets = [0, 32], sizes = [2, 32], strides = [1, 1]} : vector<2x128xf32> to vector<2x32xf32>
    %331 = vector.extract_strided_slice %328 {offsets = [0, 64], sizes = [2, 32], strides = [1, 1]} : vector<2x128xf32> to vector<2x32xf32>
    %332 = vector.extract_strided_slice %327 {offsets = [0, 96], sizes = [2, 32], strides = [1, 1]} : vector<2x128xf32> to vector<2x32xf32>
    %333 = arith.mulf %330, %291 : vector<2x32xf32>
    %334 = arith.mulf %329, %331 : vector<2x32xf32>
    %335 = arith.addf %333, %334 : vector<2x32xf32>
    %336 = math.tanh %335 : vector<2x32xf32>
    %337 = arith.mulf %332, %336 : vector<2x32xf32>
    %338 = vector.broadcast %7 : vector<1x32xf32> to vector<2x32xf32>
    %339 = arith.mulf %337, %338 : vector<2x32xf32>
    %cst_70 = arith.constant dense<0.000000e+00> : vector<2xf32>
    %340 = vector.multi_reduction <add>, %339, %cst_70 [1] : vector<2x32xf32> to vector<2xf32>
    %341 = vector.shape_cast %340 : vector<2xf32> to vector<2x1xf32>
    %342 = vector.broadcast %8 : vector<1x32xf32> to vector<2x32xf32>
    %343 = arith.mulf %311, %342 : vector<2x32xf32>
    %cst_71 = arith.constant dense<0.000000e+00> : vector<2xf32>
    %344 = vector.multi_reduction <add>, %343, %cst_71 [1] : vector<2x32xf32> to vector<2xf32>
    %345 = vector.shape_cast %344 : vector<2xf32> to vector<2x1xf32>
    %346 = arith.addf %341, %345 : vector<2x1xf32>
    %347 = vector.broadcast %9 : vector<1x1xf32> to vector<2x1xf32>
    %348 = arith.addf %346, %347 : vector<2x1xf32>
    %c0_72 = arith.constant 0 : index
    %c0_73 = arith.constant 0 : index
    %349 = vector.load %arg5[%c0_72, %c0_73] : memref<2x1xf32, #tpu.memory_space<vmem>>, vector<2x1xf32>
    tpu.vector_store %arg5[%c0_72, %c0_73], %348 {strides = array<i32>} : memref<2x1xf32, #tpu.memory_space<vmem>>, vector<2x1xf32>,
    return
  }
}

</mosaic_0001>

<bundles_post_ra>
// kernel: decoder_forward.1
= control target key start
LH: loop header
LB: loop body
LE: loop exit
PB: predicated region body
PF: predicated region fallthrough
CT: control target
= control target key end

     0   :  { %v2881_v0 = vmov 0.0   ;;  %vm2882_vm0 = vmmov 0   ;;  %vm44_vm1 = vcmask 261120   ;;  %v191_v18 = vlaneseq  ;;  %s2885_s14 = smov 32   ;;  %s2886_s17 = smov 64   ;;  %s3739_s2 = inlined_call_operand.vmem [shape: f32[96,32], index: 2, kind: input, shape index: {}]   ;;  %s3740_s0 = inlined_call_operand.vmem [shape: f32[2,7,32], index: 0, kind: input, shape index: {}]   ;;  %s3741_s4 = inlined_call_operand.vmem [shape: f32[8,128], index: 4, kind: input, shape index: {}]   ;;  %s3742_s3 = inlined_call_operand.vmem [shape: f32[64,128], index: 3, kind: input, shape index: {}]   ;;  %s3743_s1 = inlined_call_operand.vmem [shape: f32[2,7], index: 1, kind: input, shape index: {}]   ;;  %s3744_s5 = inlined_call_operand.vmem [shape: f32[2,1], index: 5, kind: output, shape index: {}]  }
   0x1   :  { %2435 = vmatprep.subr.mxu0 %v2881_v0  ;;  %v33_v1 = vld [vmem:[%s3739_s2 + $0x58] sm:$0xff]  ;;  %v32_v2 = vld [vmem:[%s3739_s2 + $0x50] sm:$0xff]  ;;  %2443 = vmatprep.mubr.msk.f32.mxu0 %vm2882_vm0, %v2881_v0  ;;  %v31_v3 = vld [vmem:[%s3739_s2 + $0x48] sm:$0xff]  ;;  %v2883_v19 = vmov 1966171168   ;;  %vm314_vm2 = vcmask 260096  }
   0x2   :  { %2436 = vmatpush3.msra.mxu0 %v33_v1  ;;  %2446 = vmatprep.subr.mxu1 %v2881_v0  ;;  %v30_v4 = vld [vmem:[%s3739_s2 + $0x40] sm:$0xff]  ;;  %v2953_v6 = vld [vmem:[%s3739_s2 + $0x38] sm:$0xff]  ;;  %v2962_v7 = vld [vmem:[%s3739_s2 + $0x30] sm:$0xff]  ;;  %v277_v20 = vunpack.c.l.s4 %v2883_v19  ;;  %v3043_v22 = vshrl.u32 %v191_v18, 7  ;;  %v328_v52 = vand.u32 127, %v191_v18  ;;  %vm337_vm3 = vcmask 1041409  }
   0x3   :  { %2437 = vmatprep.subr.mxu0 %v2881_v0  ;;  %2447 = vmatpush3.msra.mxu1 %v33_v1  ;;  %v2946_v5 = vld [vmem:[%s3740_s0] sm:$0x7f]  ;;  %v2970_v8 = vld [vmem:[%s3740_s0 + $0x8] sm:$0x7f]  ;;  %v2995_v11 = vld [vmem:[%s3739_s2 + $0x18] sm:$0xff]  ;;  %vm340_vm4 = vcmask 50176  }
   0x4   :  { %2438 = vmatpush3.msra.mxu0 %v32_v2  ;;  %2448 = vmatprep.subr.mxu1 %v2881_v0  ;;  %v2976_v9 = vld [vmem:[%s3739_s2 + $0x28] sm:$0xff]  ;;  %v2985_v10 = vld [vmem:[%s3739_s2 + $0x20] sm:$0xff]  ;;  %v3004_v12 = vld [vmem:[%s3739_s2 + $0x10] sm:$0xff]  ;;  %v278_v23 = vunpack.c.0.s8 %v277_v20  ;;  %v3046_v24 = vsub.s32 0, %v3043_v22  ;;  %v3070_v40 = vsub.s32 1, %v3043_v22  ;;  %v3081_v53 = vsub.s32 %v328_v52, %v3043_v22 }
   0x5   :  { %2439 = vmatprep.subr.mxu0 %v2881_v0  ;;  %2449 = vmatpush3.msra.mxu1 %v32_v2  ;;  %v3011_v13 = vld [vmem:[%s3739_s2 + $0x8] sm:$0xff]  ;;  %v3018_v14 = vld [vmem:[%s3739_s2] sm:$0xff]  ;;  %v2884_v60 = vmov 0   ;;  %v3120_v18 = vld [vmem:[%s3742_s3 + $0x18] sm:$0xff]  ;;  %vm201_vm5 = vcmask 523264   ;;  %v391_v52 = vsub.s32 5, %v3043_v22 }
   0x6   :  { %2440 = vmatpush3.msra.mxu0 %v31_v3  ;;  %2450 = vmatprep.subr.mxu1 %v2881_v0  ;;  %v3049_v25 = vsub.s32 %v278_v23, %v3043_v22  ;;  %v3054_v26 = vld [vmem:[%s3741_s4] sm:$0xff]  ;;  %v3127_v19 = vld [vmem:[%s3742_s3 + $0x10] sm:$0xff]  ;;  %v3134_v20 = vld [vmem:[%s3742_s3 + $0x8] sm:$0xff]  ;;  %vm2254_vm6 = vcmask 254976   ;;  %vm2278_vm7 = vcmask 1024  }
   0x7   :  { %2441 = vmatprep.subr.mxu0 %v2881_v0  ;;  %2451 = vmatpush3.msra.mxu1 %v31_v3  ;;  %v194_v28 = vrot.slane %v3054_v26, %v3046_v24  ;;  %v3074_v41 = vrot.slane %v3054_v26, %v3070_v40 }
   0x8   :  { %2442 = vmatpush3.msra.mxu0 %v30_v4  ;;  %2452 = vmatprep.subr.mxu1 %v2881_v0 }
   0x9   :  { %2444 = vmatmul.mubr.msk.f32.vlgmr.msra.gmra.mxu0 %vm44_vm1, %v2946_v5  ;;  %2457 = vmatprep.subr.mxu0 %v2881_v0 }
   0xa   :  { %2458 = vmatpush3.msra.mxu0 %v2953_v6  ;;  %2473 = vmatprep.mubr.msk.f32.mxu0 %vm2882_vm0, %v2881_v0 }
   0xb   :  { %2459 = vmatprep.subr.mxu0 %v2881_v0  ;;  %2453 = vmatpush3.msra.mxu1 %v30_v4  ;;  %v3094_v4 = vld [vmem:[%s3742_s3 + $0x38] sm:$0xff] }
   0xc   :  { %2460 = vmatpush3.msra.mxu0 %v2962_v7  ;;  %2454 = vmatprep.mubr.msk.f32.mxu1 %vm2882_vm0, %v2881_v0 }
   0xd   :  { %2461 = vmatprep.subr.mxu0 %v2881_v0  ;;  %2455 = vmatmul.mubr.msk.f32.vlgmr.msra.gmra.mxu1 %vm44_vm1, %v2970_v8 }
   0xe   :  { %2462 = vmatpush3.msra.mxu0 %v2976_v9  ;;  %2476 = vmatprep.subr.mxu1 %v2881_v0 }
   0xf   :  { %2463 = vmatprep.subr.mxu0 %v2881_v0  ;;  %2492 = vmatprep.mubr.msk.f32.mxu1 %vm2882_vm0, %v2881_v0 }
  0x10   :  { %2464 = vmatpush3.msra.mxu0 %v2985_v10  ;;  %2737 = vset.pattern.permute.xlu0 %v2884_v60 }
  0x11   :  { %2465 = vmatprep.subr.mxu0 %v2881_v0  ;;  %2736 = vset.pattern.permute.xlu1 %v2884_v60 }
  0x12   :  { %2466 = vmatpush3.msra.mxu0 %v2995_v11  ;;  %2477 = vmatpush3.msra.mxu1 %v3094_v4 }
  0x13   :  { %2467 = vmatprep.subr.mxu0 %v2881_v0  ;;  %2478 = vmatprep.subr.mxu1 %v2881_v0 }
  0x14   :  { %2468 = vmatpush3.msra.mxu0 %v3004_v12 }
  0x15   :  { %2469 = vmatprep.subr.mxu0 %v2881_v0 }
  0x16   :  { %2470 = vmatpush3.msra.mxu0 %v3011_v13 }
  0x17   :  { %2471 = vmatprep.subr.mxu0 %v2881_v0 }
  0x18   :  { %2472 = vmatpush3.msra.mxu0 %v3018_v14 }
  0x19   :  { %2474 = vmatmul.mubr.f32.vlgmr.msra.gmra.mxu0 %v2881_v0  ;;  %2495 = vmatprep.subr.mxu0 %v2881_v0 }
  0x1a   :  { %2496 = vmatpush3.msra.mxu0 %v2953_v6  ;;  %2511 = vmatprep.mubr.msk.f32.mxu0 %vm2882_vm0, %v2881_v0 }
  0x1b   :  { %2497 = vmatprep.subr.mxu0 %v2881_v0 }
  0x1c   :  { %2498 = vmatpush3.msra.mxu0 %v2962_v7 }
  0x1d   :  { %2499 = vmatprep.subr.mxu0 %v2881_v0 }
  0x1e   :  { %2500 = vmatpush3.msra.mxu0 %v2976_v9 }
  0x1f   :  { %2501 = vmatprep.subr.mxu0 %v2881_v0 }
  0x20   :  { %2502 = vmatpush3.msra.mxu0 %v2985_v10 }
  0x21   :  { %2503 = vmatprep.subr.mxu0 %v2881_v0 }
  0x22   :  { %2504 = vmatpush3.msra.mxu0 %v2995_v11 }
  0x23   :  { %2505 = vmatprep.subr.mxu0 %v2881_v0 }
  0x24   :  { %2506 = vmatpush3.msra.mxu0 %v3004_v12 }
  0x25   :  { %2507 = vmatprep.subr.mxu0 %v2881_v0 }
  0x26   :  { %2508 = vmatpush3.msra.mxu0 %v3011_v13 }
  0x27   :  { %2509 = vmatprep.subr.mxu0 %v2881_v0 }
  0x28   :  { %2510 = vmatpush3.msra.mxu0 %v3018_v14 }
  0x29   :  { %2533 = vmatprep.subr.mxu0 %v2881_v0 }
  0xc9   :  { %v114_v15 = vpop.f32.mrf.mxu0 }
  0xca   :  { %v3060_v33 = vadd.f32 %v194_v28, %v114_v15  ;;  %v3099_v15 = vld [vmem:[%s3742_s3 + $0x30] sm:$0xff] }
  0xcb   :  { %v2445_v16 = vpop.f32.mrf.mxu0  ;;  %2479 = vmatpush3.msra.mxu1 %v3099_v15 }
  0xcc   :  { %v3106_v16 = vld [vmem:[%s3742_s3 + $0x28] sm:$0xff]  ;;  %2480 = vmatprep.subr.mxu1 %v2881_v0 }
  0xcd   :  { %v187_v17 = vpop.f32.mrf.mxu1  ;;  %2481 = vmatpush3.msra.mxu1 %v3106_v16 }
  0xce   :  { %v3064_v36 = vadd.f32 %v194_v28, %v187_v17  ;;  %v3113_v17 = vld [vmem:[%s3742_s3 + $0x20] sm:$0xff]  ;;  %2482 = vmatprep.subr.mxu1 %v2881_v0 }
  0xcf   :  { %v2456_v21 = vpop.f32.mrf.mxu1  ;;  %2483 = vmatpush3.msra.mxu1 %v3113_v17 }
  0xd0   :  { %2484 = vmatprep.subr.mxu1 %v2881_v0 }
  0xd1   :  { %2485 = vmatpush3.msra.mxu1 %v3120_v18 }
  0xd2   :  { %2486 = vmatprep.subr.mxu1 %v2881_v0 }
  0xd3   :  { %2487 = vmatpush3.msra.mxu1 %v3127_v19 }
  0xd4   :  { %2488 = vmatprep.subr.mxu1 %v2881_v0 }
  0xd5   :  { %2489 = vmatpush3.msra.mxu1 %v3134_v20 }
  0xd6   :  { %2490 = vmatprep.subr.mxu1 %v2881_v0 }
  0xd9   :  { %v271_v27 = vpop.f32.mrf.mxu0 }
  0xda   :  { %v282_v29 = vrot.slane %v271_v27, %v3049_v25 }
  0xdb   :  { %v2475_v30 = vpop.f32.mrf.mxu0 }
  0xdc   :  { %v283_v31 = vcombine.high %v282_v29, %v282_v29  ;;  %v290_v32 = vrot.slane %v282_v29, %v3049_v25 }
  0xde   :  { %v297_v34 = vrot.slane %v283_v31, %v3049_v25  ;;  %v301_v35 = vrot.slane %v290_v32, %v3046_v24  ;;  %v3147_v31 = vld [vmem:[%s3742_s3] sm:$0xff] }
  0xdf   :  { %2491 = vmatpush3.msra.mxu1 %v3147_v31 }
  0xe0   :  { %v305_v37 = vrot.slane %v297_v34, %v3046_v24  ;;  %v308_v38 = vadd.f32 %v301_v35, %v3060_v33  ;;  %2514 = vmatprep.subr.mxu1 %v2881_v0 }
  0xe2   :  { %2749 = vtanh.f32 %v308_v38  ;;  %v309_v39 = vadd.f32 %v305_v37, %v3064_v36 }
  0xe4   :  { %2751 = vtanh.f32 %v309_v39 }
  0xef   :  { %v2750_v42 = vpop.eup %2749 }
  0xf0   :  { %v312_v43 = vmul.f32 %v2750_v42, %v3074_v41 }
  0xf1   :  { %v2752_v44 = vpop.eup %2751 }
  0xf2   :  { %v315_v45 = vsel %vm314_vm2, %v312_v43, 0.0  ;;  %v313_v46 = vmul.f32 %v2752_v44, %v3074_v41 }
  0xf3   :  { %316 = vadd.xlane.f32.xlu0 %v315_v45 }
  0xf4   :  { %v318_v47 = vsel %vm314_vm2, %v313_v46, 0.0 }
  0xf7   :  { %319 = vadd.xlane.f32.xlu0 %v318_v47 }
 0x17c   :  { %v317_v48 = vpop.xlane.xlu0 %316 }
 0x17d   :  { %v321_v49 = vmul.f32 1.442695, %v317_v48 }
 0x17f   :  { %2753 = vpow2.f32 %v321_v49  ;;  %v3156_v49 = vld [vmem:[%s3743_s1] sm:$0x3] }
 0x180   :  { %v320_v50 = vpop.xlane.xlu0 %319 }
 0x181   :  { %v323_v51 = vmul.f32 1.442695, %v320_v50 }
 0x183   :  { %2755 = vpow2.f32 %v323_v51 }
 0x18c   :  { %v2754_v54 = vpop.eup %2753 }
 0x18d   :  { %v332_v56 = vrot.slane %v2754_v54, %v3081_v53 }
 0x190   :  { %v2756_v55 = vpop.eup %2755 }
 0x191   :  { %v336_v57 = vrot.slane %v2756_v55, %v3081_v53 }
 0x193   :  { %v338_v58 = vsel %vm337_vm3, %v336_v57, %v332_v56 }
 0x194   :  { %v341_v59 = vsel %vm340_vm4, %v338_v58, 0.0 }
 0x195   :  { %342 = vadd.xlane.f32.xlu1 %v341_v59 }
 0x21e   :  { %v343_v61 = vpop.xlane.xlu1 %342 }
 0x21f   :  { %2757 = vrcp.f32 %v343_v61 }
 0x22c   :  { %v2758_v62 = vpop.eup %2757 }
 0x22d   :  { %v353_v63 = vrot.slane %v2758_v62, %v3070_v40  ;;  %v349_v1 = vrot.slane %v2758_v62, %v3046_v24 }
 0x22f   :  { %v357_v2 = vmul.f32 %v2756_v55, %v353_v63  ;;  %v356_v3 = vmul.f32 %v2754_v54, %v349_v1  ;;  %v3181_v54 = vrot.slane %v3054_v26, %v391_v52  ;;  %v396_v55 = vsub.s32 6, %v3043_v22 }
 0x231   :  { %365 = vperm.xlu0 %2737, %v357_v2   ;;  %360 = vperm.xlu1 %2736, %v356_v3   ;;  %v3186_v58 = vrot.slane %v3054_v26, %v396_v55 }
 0x2ac   :  { %v366_v21 = vpop.permute.xlu0 %365  ;;  %v361_v23 = vpop.permute.xlu1 %360 }
 0x2ad   :  { %v369_v27 = vmul.f32 %v366_v21, %v2970_v8  ;;  %v368_v28 = vmul.f32 %v361_v23, %v2946_v5 }
 0x2af   :  { %v377_v29 = vsel %vm314_vm2, %v369_v27, 0.0  ;;  %v370_v30 = vsel %vm314_vm2, %v368_v28, 0.0 }
 0x2b0   :  { %v378_v32 = vrot.slane %v377_v29, 4  ;;  %v371_v34 = vrot.slane %v370_v30, 4 }
 0x2b2   :  { %v379_v35 = vadd.f32 %v378_v32, %v377_v29  ;;  %v372_v37 = vadd.f32 %v371_v34, %v370_v30 }
 0x2b4   :  { %v380_v38 = vrot.slane %v379_v35, 2  ;;  %v373_v39 = vrot.slane %v372_v37, 2 }
 0x2b6   :  { %v381_v42 = vadd.f32 %v380_v38, %v379_v35  ;;  %v374_v43 = vadd.f32 %v373_v39, %v372_v37 }
 0x2b8   :  { %v382_v44 = vrot.slane %v381_v42, 1  ;;  %v375_v45 = vrot.slane %v374_v43, 1 }
 0x2ba   :  { %v376_v46 = vadd.f32 %v375_v45, %v374_v43  ;;  %v383_v47 = vadd.f32 %v382_v44, %v381_v42 }
 0x2bc   :  { %v401_v48 = vsel %vm337_vm3, %v383_v47, %v376_v46 }
 0x2bd   :  { %402 = vrot.lane.b32.xlu1 %v401_v48, %s2885_s14 }
 0x2c1   :  { %386 = vperm.xlu1 %2736, %v3156_v49  }
 0x32f   :  { %v403_v50 = vpop.permute.xlu1 %402 }
 0x330   :  { %v405_v51 = vsel %vm44_vm1, 0.0, %v403_v50 }
 0x331   :  { %2493 = vmatmul.mubr.msk.f32.vlgmr.msra.gmra.mxu1 %vm201_vm5, %v405_v51 }
 0x332   :  { %2515 = vmatpush3.msra.mxu1 %v3094_v4  ;;  %2530 = vmatprep.mubr.msk.f32.mxu1 %vm2882_vm0, %v2881_v0 }
 0x333   :  { %2516 = vmatprep.subr.mxu1 %v2881_v0 }
 0x334   :  { %2517 = vmatpush3.msra.mxu1 %v3099_v15 }
 0x335   :  { %2518 = vmatprep.subr.mxu1 %v2881_v0 }
 0x336   :  { %2519 = vmatpush3.msra.mxu1 %v3106_v16 }
 0x337   :  { %2520 = vmatprep.subr.mxu1 %v2881_v0 }
 0x338   :  { %2521 = vmatpush3.msra.mxu1 %v3113_v17 }
 0x339   :  { %2522 = vmatprep.subr.mxu1 %v2881_v0 }
 0x33a   :  { %2523 = vmatpush3.msra.mxu1 %v3120_v18 }
 0x33b   :  { %2524 = vmatprep.subr.mxu1 %v2881_v0 }
 0x33c   :  { %2525 = vmatpush3.msra.mxu1 %v3127_v19  ;;  %v387_v56 = vpop.permute.xlu1 %386 }
 0x33d   :  { %2526 = vmatprep.subr.mxu1 %v2881_v0  ;;  %v393_v57 = vmul.f32 %v3181_v54, %v387_v56 }
 0x33e   :  { %2527 = vmatpush3.msra.mxu1 %v3134_v20 }
 0x33f   :  { %2528 = vmatprep.subr.mxu1 %v2881_v0  ;;  %v398_v59 = vadd.f32 %v3186_v58, %v393_v57 }
 0x340   :  { %2529 = vmatpush3.msra.mxu1 %v3147_v31 }
 0x341   :  { %2552 = vmatprep.subr.mxu1 %v2881_v0 }
 0x3f1   :  { %v475_v61 = vpop.f32.mrf.mxu1 }
 0x3f2   :  { %v476_v62 = vadd.f32 %v475_v61, %v398_v59 }
 0x3f3   :  { %v2494_v63 = vpop.f32.mrf.mxu1 }
 0x3f4   :  { %2759 = vtanh.f32 %v476_v62  ;;  %v479_v2 = vmul.f32 0.5, %v476_v62 }
 0x3f6   :  { %2761 = vtanh.f32 %v479_v2 }
 0x401   :  { %v2760_v1 = vpop.eup %2759 }
 0x402   :  { %486 = vrot.lane.b32.xlu1 %v2760_v1, %s2886_s17 }
 0x403   :  { %v2762_v3 = vpop.eup %2761 }
 0x404   :  { %v481_v21 = vmul.f32 0.5, %v2762_v3 }
 0x406   :  { %v482_v23 = vadd.f32 0.5, %v481_v21 }
 0x408   :  { %v484_v26 = vmul.f32 0.0, %v482_v23 }
 0x474   :  { %v487_v27 = vpop.permute.xlu1 %486 }
 0x475   :  { %v489_v28 = vmul.f32 %v487_v27, %v482_v23 }
 0x477   :  { %491 = vrot.lane.b32.xlu1 %v489_v28, %s2885_s14 }
 0x4e9   :  { %v492_v29 = vpop.permute.xlu1 %491 }
 0x4ea   :  { %v3191_v30 = vadd.f32 %v492_v29, %v484_v26 }
 0x4ec   :  { %2763 = vtanh.f32 %v3191_v30 }
 0x4f9   :  { %v2764_v32 = vpop.eup %2763 }
 0x4fa   :  { %497 = vrot.lane.b32.xlu1 %v2764_v32, %s2886_s17 }
 0x56c   :  { %v498_v34 = vpop.permute.xlu1 %497 }
 0x56d   :  { %v500_v35 = vmul.f32 %v498_v34, %v482_v23 }
 0x56f   :  { %502 = vrot.lane.b32.xlu1 %v500_v35, %s2885_s14 }
 0x5e1   :  { %v3196_v37 = vpop.permute.xlu1 %502 }
 0x5e2   :  { %v505_v38 = vsel %vm44_vm1, %v3196_v37, %v3191_v30 }
 0x5e3   :  { %2512 = vmatmul.mubr.msk.f32.vlgmr.msra.gmra.mxu0 %vm201_vm5, %v505_v38 }
 0x5e4   :  { %2534 = vmatpush3.msra.mxu0 %v2953_v6  ;;  %2549 = vmatprep.mubr.msk.f32.mxu0 %vm2882_vm0, %v2881_v0 }
 0x5e5   :  { %2535 = vmatprep.subr.mxu0 %v2881_v0 }
 0x5e6   :  { %2536 = vmatpush3.msra.mxu0 %v2962_v7 }
 0x5e7   :  { %2537 = vmatprep.subr.mxu0 %v2881_v0 }
 0x5e8   :  { %2538 = vmatpush3.msra.mxu0 %v2976_v9 }
 0x5e9   :  { %2539 = vmatprep.subr.mxu0 %v2881_v0 }
 0x5ea   :  { %2540 = vmatpush3.msra.mxu0 %v2985_v10 }
 0x5eb   :  { %2541 = vmatprep.subr.mxu0 %v2881_v0 }
 0x5ec   :  { %2542 = vmatpush3.msra.mxu0 %v2995_v11 }
 0x5ed   :  { %2543 = vmatprep.subr.mxu0 %v2881_v0 }
 0x5ee   :  { %2544 = vmatpush3.msra.mxu0 %v3004_v12 }
 0x5ef   :  { %2545 = vmatprep.subr.mxu0 %v2881_v0 }
 0x5f0   :  { %2546 = vmatpush3.msra.mxu0 %v3011_v13 }
 0x5f1   :  { %2547 = vmatprep.subr.mxu0 %v2881_v0 }
 0x5f2   :  { %2548 = vmatpush3.msra.mxu0 %v3018_v14 }
 0x5f3   :  { %2571 = vmatprep.subr.mxu0 %v2881_v0 }
 0x6a3   :  { %v575_v39 = vpop.f32.mrf.mxu0 }
 0x6a4   :  { %v586_v42 = vrot.slane %v575_v39, %v3049_v25 }
 0x6a5   :  { %v2513_v43 = vpop.f32.mrf.mxu0 }
 0x6a6   :  { %v587_v44 = vcombine.high %v586_v42, %v586_v42  ;;  %v594_v45 = vrot.slane %v586_v42, %v3049_v25 }
 0x6a8   :  { %v601_v46 = vrot.slane %v587_v44, %v3049_v25  ;;  %v605_v47 = vrot.slane %v594_v45, %v3046_v24 }
 0x6aa   :  { %v609_v48 = vrot.slane %v601_v46, %v3046_v24  ;;  %v612_v50 = vadd.f32 %v605_v47, %v3060_v33 }
 0x6ac   :  { %v613_v51 = vadd.f32 %v609_v48, %v3064_v36  ;;  %2765 = vtanh.f32 %v612_v50 }
 0x6ae   :  { %2767 = vtanh.f32 %v613_v51 }
 0x6b9   :  { %v2766_v52 = vpop.eup %2765 }
 0x6ba   :  { %v616_v55 = vmul.f32 %v2766_v52, %v3074_v41 }
 0x6bb   :  { %v2768_v56 = vpop.eup %2767 }
 0x6bc   :  { %v618_v57 = vsel %vm314_vm2, %v616_v55, 0.0  ;;  %v617_v59 = vmul.f32 %v2768_v56, %v3074_v41  ;;  %v2887_v55 = vmov 1  }
 0x6bd   :  { %619 = vadd.xlane.f32.xlu1 %v618_v57 }
 0x6be   :  { %v621_v61 = vsel %vm314_vm2, %v617_v59, 0.0 }
 0x6bf   :  { %622 = vadd.xlane.f32.xlu0 %v621_v61 }
 0x746   :  { %v620_v62 = vpop.xlane.xlu1 %619 }
 0x747   :  { %v624_v63 = vmul.f32 1.442695, %v620_v62 }
 0x748   :  { %v623_v1 = vpop.xlane.xlu0 %622 }
 0x749   :  { %2769 = vpow2.f32 %v624_v63  ;;  %v626_v2 = vmul.f32 1.442695, %v623_v1 }
 0x74b   :  { %2771 = vpow2.f32 %v626_v2 }
 0x756   :  { %v2770_v3 = vpop.eup %2769 }
 0x757   :  { %v633_v23 = vrot.slane %v2770_v3, %v3081_v53 }
 0x758   :  { %v2772_v21 = vpop.eup %2771 }
 0x759   :  { %v637_v27 = vrot.slane %v2772_v21, %v3081_v53 }
 0x75b   :  { %v638_v28 = vsel %vm337_vm3, %v637_v27, %v633_v23 }
 0x75c   :  { %v640_v26 = vsel %vm340_vm4, %v638_v28, 0.0 }
 0x75d   :  { %641 = vadd.xlane.f32.xlu1 %v640_v26 }
 0x7e6   :  { %v642_v29 = vpop.xlane.xlu1 %641 }
 0x7e7   :  { %2773 = vrcp.f32 %v642_v29 }
 0x7f4   :  { %v2774_v32 = vpop.eup %2773 }
 0x7f5   :  { %v652_v34 = vrot.slane %v2774_v32, %v3070_v40  ;;  %v648_v35 = vrot.slane %v2774_v32, %v3046_v24 }
 0x7f7   :  { %v656_v38 = vmul.f32 %v2772_v21, %v652_v34  ;;  %v655_v39 = vmul.f32 %v2770_v3, %v648_v35 }
 0x7f9   :  { %664 = vperm.xlu1 %2736, %v656_v38   ;;  %659 = vperm.xlu0 %2737, %v655_v39  }
 0x7fd   :  { %2738 = vset.pattern.permute.xlu0 %v2887_v55 }
 0x7fe   :  { %684 = vperm.xlu0 %2738, %v3156_v49  }
 0x802   :  { %2739 = vset.pattern.permute.xlu0 %v2884_v60 }
 0x874   :  { %v665_v42 = vpop.permute.xlu1 %664  ;;  %v660_v43 = vpop.permute.xlu0 %659 }
 0x875   :  { %v668_v44 = vmul.f32 %v665_v42, %v2970_v8  ;;  %v667_v45 = vmul.f32 %v660_v43, %v2946_v5 }
 0x877   :  { %v676_v46 = vsel %vm314_vm2, %v668_v44, 0.0  ;;  %v669_v47 = vsel %vm314_vm2, %v667_v45, 0.0 }
 0x878   :  { %v677_v48 = vrot.slane %v676_v46, 4  ;;  %v670_v50 = vrot.slane %v669_v47, 4 }
 0x87a   :  { %v678_v51 = vadd.f32 %v677_v48, %v676_v46  ;;  %v671_v52 = vadd.f32 %v670_v50, %v669_v47 }
 0x87c   :  { %v679_v56 = vrot.slane %v678_v51, 2  ;;  %v672_v57 = vrot.slane %v671_v52, 2 }
 0x87e   :  { %v680_v59 = vadd.f32 %v679_v56, %v678_v51  ;;  %v673_v61 = vadd.f32 %v672_v57, %v671_v52 }
 0x880   :  { %v681_v62 = vrot.slane %v680_v59, 1  ;;  %v674_v63 = vrot.slane %v673_v61, 1 }
 0x882   :  { %v675_v1 = vadd.f32 %v674_v63, %v673_v61  ;;  %v682_v2 = vadd.f32 %v681_v62, %v680_v59 }
 0x884   :  { %v691_v3 = vsel %vm337_vm3, %v682_v2, %v675_v1 }
 0x885   :  { %692 = vrot.lane.b32.xlu1 %v691_v3, %s2885_s14 }
 0x8f7   :  { %v693_v21 = vpop.permute.xlu1 %692 }
 0x8f8   :  { %v695_v23 = vsel %vm44_vm1, %v3196_v37, %v693_v21  ;;  %v685_v37 = vpop.permute.xlu0 %684 }
 0x8f9   :  { %2531 = vmatmul.mubr.msk.f32.vlgmr.msra.gmra.mxu1 %vm201_vm5, %v695_v23  ;;  %v687_v27 = vmul.f32 %v685_v37, %v3181_v54 }
 0x8fa   :  { %2553 = vmatpush3.msra.mxu1 %v3094_v4  ;;  %2568 = vmatprep.mubr.msk.f32.mxu1 %vm2882_vm0, %v2881_v0 }
 0x8fb   :  { %2554 = vmatprep.subr.mxu1 %v2881_v0  ;;  %v688_v28 = vadd.f32 %v687_v27, %v3186_v58 }
 0x8fc   :  { %2555 = vmatpush3.msra.mxu1 %v3099_v15 }
 0x8fd   :  { %2556 = vmatprep.subr.mxu1 %v2881_v0 }
 0x8fe   :  { %2557 = vmatpush3.msra.mxu1 %v3106_v16 }
 0x8ff   :  { %2558 = vmatprep.subr.mxu1 %v2881_v0 }
 0x900   :  { %2559 = vmatpush3.msra.mxu1 %v3113_v17 }
 0x901   :  { %2560 = vmatprep.subr.mxu1 %v2881_v0 }
 0x902   :  { %2561 = vmatpush3.msra.mxu1 %v3120_v18 }
 0x903   :  { %2562 = vmatprep.subr.mxu1 %v2881_v0 }
 0x904   :  { %2563 = vmatpush3.msra.mxu1 %v3127_v19 }
 0x905   :  { %2564 = vmatprep.subr.mxu1 %v2881_v0 }
 0x906   :  { %2565 = vmatpush3.msra.mxu1 %v3134_v20 }
 0x907   :  { %2566 = vmatprep.subr.mxu1 %v2881_v0 }
 0x908   :  { %2567 = vmatpush3.msra.mxu1 %v3147_v31 }
 0x909   :  { %2590 = vmatprep.subr.mxu1 %v2881_v0 }
 0x9b9   :  { %v765_v26 = vpop.f32.mrf.mxu1 }
 0x9ba   :  { %v766_v29 = vadd.f32 %v765_v26, %v688_v28 }
 0x9bb   :  { %v2532_v32 = vpop.f32.mrf.mxu1 }
 0x9bc   :  { %2775 = vtanh.f32 %v766_v29  ;;  %v769_v35 = vmul.f32 0.5, %v766_v29 }
 0x9be   :  { %2777 = vtanh.f32 %v769_v35 }
 0x9c9   :  { %v2776_v34 = vpop.eup %2775 }
 0x9ca   :  { %776 = vrot.lane.b32.xlu1 %v2776_v34, %s2886_s17 }
 0x9cb   :  { %v2778_v38 = vpop.eup %2777 }
 0x9cc   :  { %v771_v39 = vmul.f32 0.5, %v2778_v38 }
 0x9ce   :  { %v772_v42 = vadd.f32 0.5, %v771_v39 }
 0x9d0   :  { %v774_v45 = vmul.f32 %v772_v42, %v3191_v30 }
 0xa3c   :  { %v777_v43 = vpop.permute.xlu1 %776 }
 0xa3d   :  { %v779_v44 = vmul.f32 %v777_v43, %v772_v42 }
 0xa3f   :  { %781 = vrot.lane.b32.xlu1 %v779_v44, %s2885_s14 }
 0xab1   :  { %v782_v46 = vpop.permute.xlu1 %781 }
 0xab2   :  { %v3271_v47 = vadd.f32 %v782_v46, %v774_v45 }
 0xab4   :  { %2779 = vtanh.f32 %v3271_v47 }
 0xac1   :  { %v2780_v48 = vpop.eup %2779 }
 0xac2   :  { %787 = vrot.lane.b32.xlu0 %v2780_v48, %s2886_s17 }
 0xb34   :  { %v788_v50 = vpop.permute.xlu0 %787 }
 0xb35   :  { %v790_v51 = vmul.f32 %v788_v50, %v772_v42 }
 0xb37   :  { %792 = vrot.lane.b32.xlu1 %v790_v51, %s2885_s14 }
 0xba9   :  { %v3276_v52 = vpop.permute.xlu1 %792 }
 0xbaa   :  { %v795_v55 = vsel %vm44_vm1, %v3276_v52, %v3271_v47 }
 0xbab   :  { %2550 = vmatmul.mubr.msk.f32.vlgmr.msra.gmra.mxu0 %vm201_vm5, %v795_v55 }
 0xbac   :  { %2572 = vmatpush3.msra.mxu0 %v2953_v6  ;;  %2587 = vmatprep.mubr.msk.f32.mxu0 %vm2882_vm0, %v2881_v0 }
 0xbad   :  { %2573 = vmatprep.subr.mxu0 %v2881_v0 }
 0xbae   :  { %2574 = vmatpush3.msra.mxu0 %v2962_v7 }
 0xbaf   :  { %2575 = vmatprep.subr.mxu0 %v2881_v0 }
 0xbb0   :  { %2576 = vmatpush3.msra.mxu0 %v2976_v9 }
 0xbb1   :  { %2577 = vmatprep.subr.mxu0 %v2881_v0 }
 0xbb2   :  { %2578 = vmatpush3.msra.mxu0 %v2985_v10 }
 0xbb3   :  { %2579 = vmatprep.subr.mxu0 %v2881_v0 }
 0xbb4   :  { %2580 = vmatpush3.msra.mxu0 %v2995_v11 }
 0xbb5   :  { %2581 = vmatprep.subr.mxu0 %v2881_v0 }
 0xbb6   :  { %2582 = vmatpush3.msra.mxu0 %v3004_v12 }
 0xbb7   :  { %2583 = vmatprep.subr.mxu0 %v2881_v0 }
 0xbb8   :  { %2584 = vmatpush3.msra.mxu0 %v3011_v13 }
 0xbb9   :  { %2585 = vmatprep.subr.mxu0 %v2881_v0 }
 0xbba   :  { %2586 = vmatpush3.msra.mxu0 %v3018_v14 }
 0xbbb   :  { %2609 = vmatprep.subr.mxu0 %v2881_v0 }
 0xc6b   :  { %v865_v30 = vpop.f32.mrf.mxu0 }
 0xc6c   :  { %v876_v56 = vrot.slane %v865_v30, %v3049_v25 }
 0xc6d   :  { %v2551_v57 = vpop.f32.mrf.mxu0 }
 0xc6e   :  { %v877_v59 = vcombine.high %v876_v56, %v876_v56  ;;  %v884_v61 = vrot.slane %v876_v56, %v3049_v25 }
 0xc70   :  { %v891_v62 = vrot.slane %v877_v59, %v3049_v25  ;;  %v895_v63 = vrot.slane %v884_v61, %v3046_v24 }
 0xc72   :  { %v899_v1 = vrot.slane %v891_v62, %v3046_v24  ;;  %v902_v2 = vadd.f32 %v895_v63, %v3060_v33 }
 0xc74   :  { %v903_v3 = vadd.f32 %v899_v1, %v3064_v36  ;;  %2781 = vtanh.f32 %v902_v2 }
 0xc76   :  { %2783 = vtanh.f32 %v903_v3 }
 0xc81   :  { %v2782_v21 = vpop.eup %2781 }
 0xc82   :  { %v906_v23 = vmul.f32 %v2782_v21, %v3074_v41 }
 0xc83   :  { %v2784_v37 = vpop.eup %2783 }
 0xc84   :  { %v908_v27 = vsel %vm314_vm2, %v906_v23, 0.0  ;;  %v907_v28 = vmul.f32 %v2784_v37, %v3074_v41  ;;  %v2888_v23 = vmov 2  }
 0xc85   :  { %909 = vadd.xlane.f32.xlu0 %v908_v27 }
 0xc86   :  { %v911_v26 = vsel %vm314_vm2, %v907_v28, 0.0 }
 0xc87   :  { %912 = vadd.xlane.f32.xlu1 %v911_v26 }
 0xd0e   :  { %v910_v29 = vpop.xlane.xlu0 %909 }
 0xd0f   :  { %v914_v32 = vmul.f32 1.442695, %v910_v29 }
 0xd10   :  { %v913_v34 = vpop.xlane.xlu1 %912 }
 0xd11   :  { %2785 = vpow2.f32 %v914_v32  ;;  %v916_v35 = vmul.f32 1.442695, %v913_v34 }
 0xd13   :  { %2787 = vpow2.f32 %v916_v35 }
 0xd1e   :  { %v2786_v38 = vpop.eup %2785 }
 0xd1f   :  { %v923_v42 = vrot.slane %v2786_v38, %v3081_v53 }
 0xd20   :  { %v2788_v39 = vpop.eup %2787 }
 0xd21   :  { %v927_v43 = vrot.slane %v2788_v39, %v3081_v53 }
 0xd23   :  { %v928_v44 = vsel %vm337_vm3, %v927_v43, %v923_v42 }
 0xd24   :  { %v930_v45 = vsel %vm340_vm4, %v928_v44, 0.0 }
 0xd25   :  { %931 = vadd.xlane.f32.xlu0 %v930_v45 }
 0xdae   :  { %v932_v46 = vpop.xlane.xlu0 %931 }
 0xdaf   :  { %2789 = vrcp.f32 %v932_v46 }
 0xdbc   :  { %v2790_v48 = vpop.eup %2789 }
 0xdbd   :  { %v942_v50 = vrot.slane %v2790_v48, %v3070_v40  ;;  %v938_v51 = vrot.slane %v2790_v48, %v3046_v24 }
 0xdbf   :  { %v946_v55 = vmul.f32 %v2788_v39, %v942_v50  ;;  %v945_v30 = vmul.f32 %v2786_v38, %v938_v51 }
 0xdc1   :  { %954 = vperm.xlu1 %2736, %v946_v55   ;;  %949 = vperm.xlu0 %2739, %v945_v30  }
 0xdc5   :  { %2740 = vset.pattern.permute.xlu1 %v2888_v23 }
 0xe3c   :  { %v955_v56 = vpop.permute.xlu1 %954  ;;  %v950_v57 = vpop.permute.xlu0 %949 }
 0xe3d   :  { %v958_v59 = vmul.f32 %v955_v56, %v2970_v8  ;;  %v957_v61 = vmul.f32 %v950_v57, %v2946_v5 }
 0xe3f   :  { %v966_v62 = vsel %vm314_vm2, %v958_v59, 0.0  ;;  %v959_v63 = vsel %vm314_vm2, %v957_v61, 0.0 }
 0xe40   :  { %v967_v1 = vrot.slane %v966_v62, 4  ;;  %v960_v2 = vrot.slane %v959_v63, 4 }
 0xe42   :  { %v968_v3 = vadd.f32 %v967_v1, %v966_v62  ;;  %v961_v21 = vadd.f32 %v960_v2, %v959_v63 }
 0xe44   :  { %v969_v37 = vrot.slane %v968_v3, 2  ;;  %v962_v27 = vrot.slane %v961_v21, 2 }
 0xe46   :  { %v970_v28 = vadd.f32 %v969_v37, %v968_v3  ;;  %v963_v26 = vadd.f32 %v962_v27, %v961_v21 }
 0xe48   :  { %v971_v29 = vrot.slane %v970_v28, 1  ;;  %v964_v32 = vrot.slane %v963_v26, 1 }
 0xe4a   :  { %v965_v34 = vadd.f32 %v964_v32, %v963_v26  ;;  %v972_v8 = vadd.f32 %v971_v29, %v970_v28 }
 0xe4c   :  { %v981_v5 = vsel %vm337_vm3, %v972_v8, %v965_v34 }
 0xe4d   :  { %982 = vrot.lane.b32.xlu1 %v981_v5, %s2885_s14 }
 0xe51   :  { %974 = vperm.xlu1 %2740, %v3156_v49  }
 0xe55   :  { %2741 = vset.pattern.permute.xlu1 %v2884_v60 }
 0xebf   :  { %v983_v35 = vpop.permute.xlu1 %982 }
 0xec0   :  { %v985_v38 = vsel %vm44_vm1, %v3276_v52, %v983_v35 }
 0xec1   :  { %2569 = vmatmul.mubr.msk.f32.vlgmr.msra.gmra.mxu1 %vm201_vm5, %v985_v38 }
 0xec2   :  { %2591 = vmatpush3.msra.mxu1 %v3094_v4  ;;  %2606 = vmatprep.mubr.msk.f32.mxu1 %vm2882_vm0, %v2881_v0 }
 0xec3   :  { %2592 = vmatprep.subr.mxu1 %v2881_v0 }
 0xec4   :  { %2593 = vmatpush3.msra.mxu1 %v3099_v15 }
 0xec5   :  { %2594 = vmatprep.subr.mxu1 %v2881_v0 }
 0xec6   :  { %2595 = vmatpush3.msra.mxu1 %v3106_v16 }
 0xec7   :  { %2596 = vmatprep.subr.mxu1 %v2881_v0 }
 0xec8   :  { %2597 = vmatpush3.msra.mxu1 %v3113_v17 }
 0xec9   :  { %2598 = vmatprep.subr.mxu1 %v2881_v0 }
 0xeca   :  { %2599 = vmatpush3.msra.mxu1 %v3120_v18 }
 0xecb   :  { %2600 = vmatprep.subr.mxu1 %v2881_v0 }
 0xecc   :  { %2601 = vmatpush3.msra.mxu1 %v3127_v19  ;;  %v975_v52 = vpop.permute.xlu1 %974 }
 0xecd   :  { %2602 = vmatprep.subr.mxu1 %v2881_v0  ;;  %v977_v39 = vmul.f32 %v975_v52, %v3181_v54 }
 0xece   :  { %2603 = vmatpush3.msra.mxu1 %v3134_v20 }
 0xecf   :  { %2604 = vmatprep.subr.mxu1 %v2881_v0  ;;  %v978_v42 = vadd.f32 %v977_v39, %v3186_v58 }
 0xed0   :  { %2605 = vmatpush3.msra.mxu1 %v3147_v31 }
 0xed1   :  { %2628 = vmatprep.subr.mxu1 %v2881_v0 }
 0xf81   :  { %v1055_v43 = vpop.f32.mrf.mxu1 }
 0xf82   :  { %v1056_v44 = vadd.f32 %v1055_v43, %v978_v42 }
 0xf83   :  { %v2570_v45 = vpop.f32.mrf.mxu1 }
 0xf84   :  { %2791 = vtanh.f32 %v1056_v44  ;;  %v1059_v48 = vmul.f32 0.5, %v1056_v44 }
 0xf86   :  { %2793 = vtanh.f32 %v1059_v48 }
 0xf91   :  { %v2792_v46 = vpop.eup %2791 }
 0xf92   :  { %1066 = vrot.lane.b32.xlu1 %v2792_v46, %s2886_s17 }
 0xf93   :  { %v2794_v50 = vpop.eup %2793 }
 0xf94   :  { %v1061_v51 = vmul.f32 0.5, %v2794_v50 }
 0xf96   :  { %v1062_v55 = vadd.f32 0.5, %v1061_v51 }
 0xf98   :  { %v1064_v57 = vmul.f32 %v1062_v55, %v3271_v47 }
0x1004   :  { %v1067_v30 = vpop.permute.xlu1 %1066 }
0x1005   :  { %v1069_v56 = vmul.f32 %v1067_v30, %v1062_v55 }
0x1007   :  { %1071 = vrot.lane.b32.xlu1 %v1069_v56, %s2885_s14  ;;  %v3400_v56 = vld [vmem:[%s3740_s0 + $0x8] sm:$0x7f] }
0x1079   :  { %v1072_v59 = vpop.permute.xlu1 %1071 }
0x107a   :  { %v3351_v61 = vadd.f32 %v1072_v59, %v1064_v57  ;;  %v3406_v59 = vld [vmem:[%s3740_s0] sm:$0x7f] }
0x107c   :  { %2795 = vtanh.f32 %v3351_v61 }
0x1089   :  { %v2796_v62 = vpop.eup %2795 }
0x108a   :  { %1077 = vrot.lane.b32.xlu1 %v2796_v62, %s2886_s17 }
0x10fc   :  { %v1078_v63 = vpop.permute.xlu1 %1077 }
0x10fd   :  { %v1080_v1 = vmul.f32 %v1078_v63, %v1062_v55 }
0x10ff   :  { %1082 = vrot.lane.b32.xlu1 %v1080_v1, %s2885_s14 }
0x1171   :  { %v3356_v2 = vpop.permute.xlu1 %1082 }
0x1172   :  { %v1085_v3 = vsel %vm44_vm1, %v3356_v2, %v3351_v61 }
0x1173   :  { %2588 = vmatmul.mubr.msk.f32.vlgmr.msra.gmra.mxu0 %vm201_vm5, %v1085_v3 }
0x1174   :  { %2610 = vmatpush3.msra.mxu0 %v2953_v6  ;;  %2625 = vmatprep.mubr.msk.f32.mxu0 %vm2882_vm0, %v2881_v0 }
0x1175   :  { %2611 = vmatprep.subr.mxu0 %v2881_v0 }
0x1176   :  { %2612 = vmatpush3.msra.mxu0 %v2962_v7 }
0x1177   :  { %2613 = vmatprep.subr.mxu0 %v2881_v0 }
0x1178   :  { %2614 = vmatpush3.msra.mxu0 %v2976_v9 }
0x1179   :  { %2615 = vmatprep.subr.mxu0 %v2881_v0 }
0x117a   :  { %2616 = vmatpush3.msra.mxu0 %v2985_v10 }
0x117b   :  { %2617 = vmatprep.subr.mxu0 %v2881_v0 }
0x117c   :  { %2618 = vmatpush3.msra.mxu0 %v2995_v11 }
0x117d   :  { %2619 = vmatprep.subr.mxu0 %v2881_v0 }
0x117e   :  { %2620 = vmatpush3.msra.mxu0 %v3004_v12 }
0x117f   :  { %2621 = vmatprep.subr.mxu0 %v2881_v0 }
0x1180   :  { %2622 = vmatpush3.msra.mxu0 %v3011_v13 }
0x1181   :  { %2623 = vmatprep.subr.mxu0 %v2881_v0 }
0x1182   :  { %2624 = vmatpush3.msra.mxu0 %v3018_v14 }
0x1183   :  { %2647 = vmatprep.subr.mxu0 %v2881_v0 }
0x1233   :  { %v1155_v6 = vpop.f32.mrf.mxu0 }
0x1234   :  { %v1166_v7 = vrot.slane %v1155_v6, %v3049_v25 }
0x1235   :  { %v2589_v9 = vpop.f32.mrf.mxu0 }
0x1236   :  { %v1167_v10 = vcombine.high %v1166_v7, %v1166_v7  ;;  %v1174_v11 = vrot.slane %v1166_v7, %v3049_v25 }
0x1238   :  { %v1181_v47 = vrot.slane %v1167_v10, %v3049_v25  ;;  %v1185_v12 = vrot.slane %v1174_v11, %v3046_v24  ;;  %v2889_v10 = vmov 3  }
0x123a   :  { %v1189_v21 = vrot.slane %v1181_v47, %v3046_v24  ;;  %v1192_v13 = vadd.f32 %v1185_v12, %v3060_v33 }
0x123c   :  { %v1193_v23 = vadd.f32 %v1189_v21, %v3064_v36  ;;  %2797 = vtanh.f32 %v1192_v13 }
0x123e   :  { %2799 = vtanh.f32 %v1193_v23 }
0x1249   :  { %v2798_v14 = vpop.eup %2797 }
0x124a   :  { %v1196_v37 = vmul.f32 %v2798_v14, %v3074_v41 }
0x124b   :  { %v2800_v27 = vpop.eup %2799 }
0x124c   :  { %v1198_v28 = vsel %vm314_vm2, %v1196_v37, 0.0  ;;  %v1197_v26 = vmul.f32 %v2800_v27, %v3074_v41 }
0x124d   :  { %1199 = vadd.xlane.f32.xlu1 %v1198_v28 }
0x124e   :  { %v1201_v29 = vsel %vm314_vm2, %v1197_v26, 0.0 }
0x124f   :  { %1202 = vadd.xlane.f32.xlu0 %v1201_v29 }
0x12d6   :  { %v1200_v32 = vpop.xlane.xlu1 %1199 }
0x12d7   :  { %v1204_v34 = vmul.f32 1.442695, %v1200_v32 }
0x12d8   :  { %v1203_v8 = vpop.xlane.xlu0 %1202 }
0x12d9   :  { %2801 = vpow2.f32 %v1204_v34  ;;  %v1206_v5 = vmul.f32 1.442695, %v1203_v8 }
0x12db   :  { %2803 = vpow2.f32 %v1206_v5 }
0x12e6   :  { %v2802_v35 = vpop.eup %2801 }
0x12e7   :  { %v1213_v52 = vrot.slane %v2802_v35, %v3081_v53 }
0x12e8   :  { %v2804_v38 = vpop.eup %2803 }
0x12e9   :  { %v1217_v39 = vrot.slane %v2804_v38, %v3081_v53 }
0x12eb   :  { %v1218_v42 = vsel %vm337_vm3, %v1217_v39, %v1213_v52 }
0x12ec   :  { %v1220_v43 = vsel %vm340_vm4, %v1218_v42, 0.0 }
0x12ed   :  { %1221 = vadd.xlane.f32.xlu0 %v1220_v43 }
0x1376   :  { %v1222_v44 = vpop.xlane.xlu0 %1221 }
0x1377   :  { %2805 = vrcp.f32 %v1222_v44  ;;  %v3464_v44 = vld [vmem:[%s3739_s2 + $0x30] sm:$0xff] }
0x1384   :  { %v2806_v45 = vpop.eup %2805 }
0x1385   :  { %v1232_v46 = vrot.slane %v2806_v45, %v3070_v40  ;;  %v1228_v48 = vrot.slane %v2806_v45, %v3046_v24  ;;  %v3471_v45 = vld [vmem:[%s3739_s2 + $0x28] sm:$0xff] }
0x1387   :  { %v1236_v50 = vmul.f32 %v2804_v38, %v1232_v46  ;;  %v1235_v51 = vmul.f32 %v2802_v35, %v1228_v48  ;;  %v3478_v46 = vld [vmem:[%s3739_s2 + $0x20] sm:$0xff]  ;;  %v3485_v48 = vld [vmem:[%s3739_s2 + $0x18] sm:$0xff] }
0x1389   :  { %1244 = vperm.xlu1 %2741, %v1236_v50   ;;  %1239 = vperm.xlu0 %2739, %v1235_v51   ;;  %v3492_v50 = vld [vmem:[%s3739_s2 + $0x10] sm:$0xff]  ;;  %v3499_v51 = vld [vmem:[%s3739_s2 + $0x8] sm:$0xff] }
0x138d   :  { %2742 = vset.pattern.permute.xlu1 %v2889_v10 }
0x1404   :  { %v1245_v55 = vpop.permute.xlu1 %1244  ;;  %v1240_v30 = vpop.permute.xlu0 %1239 }
0x1405   :  { %v1248_v57 = vmul.f32 %v3400_v56, %v1245_v55  ;;  %v1247_v62 = vmul.f32 %v3406_v59, %v1240_v30  ;;  %v3506_v55 = vld [vmem:[%s3739_s2] sm:$0xff] }
0x1407   :  { %v1256_v63 = vsel %vm314_vm2, %v1248_v57, 0.0  ;;  %v1249_v1 = vsel %vm314_vm2, %v1247_v62, 0.0 }
0x1408   :  { %v1257_v3 = vrot.slane %v1256_v63, 4  ;;  %v1250_v6 = vrot.slane %v1249_v1, 4 }
0x140a   :  { %v1258_v7 = vadd.f32 %v1257_v3, %v1256_v63  ;;  %v1251_v9 = vadd.f32 %v1250_v6, %v1249_v1 }
0x140c   :  { %v1259_v11 = vrot.slane %v1258_v7, 2  ;;  %v1252_v47 = vrot.slane %v1251_v9, 2 }
0x140e   :  { %v1260_v12 = vadd.f32 %v1259_v11, %v1258_v7  ;;  %v1253_v21 = vadd.f32 %v1252_v47, %v1251_v9 }
0x1410   :  { %v1261_v13 = vrot.slane %v1260_v12, 1  ;;  %v1254_v23 = vrot.slane %v1253_v21, 1 }
0x1412   :  { %v1255_v14 = vadd.f32 %v1254_v23, %v1253_v21  ;;  %v1262_v37 = vadd.f32 %v1261_v13, %v1260_v12 }
0x1414   :  { %v1271_v27 = vsel %vm337_vm3, %v1262_v37, %v1255_v14 }
0x1415   :  { %1272 = vrot.lane.b32.xlu1 %v1271_v27, %s2885_s14 }
0x1419   :  { %1264 = vperm.xlu1 %2742, %v3156_v49  }
0x141d   :  { %2743 = vset.pattern.permute.xlu1 %v2884_v60 }
0x1487   :  { %v1273_v28 = vpop.permute.xlu1 %1272 }
0x1488   :  { %v1275_v26 = vsel %vm44_vm1, %v3356_v2, %v1273_v28 }
0x1489   :  { %2607 = vmatmul.mubr.msk.f32.vlgmr.msra.gmra.mxu1 %vm201_vm5, %v1275_v26 }
0x148a   :  { %2629 = vmatpush3.msra.mxu1 %v3094_v4  ;;  %2644 = vmatprep.mubr.msk.f32.mxu1 %vm2882_vm0, %v2881_v0 }
0x148b   :  { %2630 = vmatprep.subr.mxu1 %v2881_v0 }
0x148c   :  { %2631 = vmatpush3.msra.mxu1 %v3099_v15 }
0x148d   :  { %2632 = vmatprep.subr.mxu1 %v2881_v0 }
0x148e   :  { %2633 = vmatpush3.msra.mxu1 %v3106_v16 }
0x148f   :  { %2634 = vmatprep.subr.mxu1 %v2881_v0 }
0x1490   :  { %2635 = vmatpush3.msra.mxu1 %v3113_v17 }
0x1491   :  { %2636 = vmatprep.subr.mxu1 %v2881_v0 }
0x1492   :  { %2637 = vmatpush3.msra.mxu1 %v3120_v18 }
0x1493   :  { %2638 = vmatprep.subr.mxu1 %v2881_v0 }
0x1494   :  { %2639 = vmatpush3.msra.mxu1 %v3127_v19  ;;  %v1265_v4 = vpop.permute.xlu1 %1264 }
0x1495   :  { %2640 = vmatprep.subr.mxu1 %v2881_v0  ;;  %v1267_v15 = vmul.f32 %v1265_v4, %v3181_v54 }
0x1496   :  { %2641 = vmatpush3.msra.mxu1 %v3134_v20 }
0x1497   :  { %2642 = vmatprep.subr.mxu1 %v2881_v0  ;;  %v1268_v16 = vadd.f32 %v1267_v15, %v3186_v58 }
0x1498   :  { %2643 = vmatpush3.msra.mxu1 %v3147_v31 }
0x1499   :  { %2666 = vmatprep.subr.mxu1 %v2881_v0 }
0x1549   :  { %v1345_v17 = vpop.f32.mrf.mxu1 }
0x154a   :  { %v1346_v18 = vadd.f32 %v1345_v17, %v1268_v16 }
0x154b   :  { %v2608_v49 = vpop.f32.mrf.mxu1 }
0x154c   :  { %2807 = vtanh.f32 %v1346_v18  ;;  %v1349_v2 = vmul.f32 0.5, %v1346_v18 }
0x154e   :  { %2809 = vtanh.f32 %v1349_v2 }
0x1559   :  { %v2808_v19 = vpop.eup %2807 }
0x155a   :  { %1356 = vrot.lane.b32.xlu0 %v2808_v19, %s2886_s17 }
0x155b   :  { %v2810_v20 = vpop.eup %2809 }
0x155c   :  { %v1351_v29 = vmul.f32 0.5, %v2810_v20 }
0x155e   :  { %v1352_v32 = vadd.f32 0.5, %v1351_v29 }
0x1560   :  { %v1354_v8 = vmul.f32 %v1352_v32, %v3351_v61  ;;  %v3455_v61 = vld [vmem:[%s3739_s2 + $0x38] sm:$0xff] }
0x15cc   :  { %v1357_v31 = vpop.permute.xlu0 %1356 }
0x15cd   :  { %v1359_v34 = vmul.f32 %v1357_v31, %v1352_v32 }
0x15cf   :  { %1361 = vrot.lane.b32.xlu1 %v1359_v34, %s2885_s14 }
0x1641   :  { %v1362_v5 = vpop.permute.xlu1 %1361 }
0x1642   :  { %v3441_v35 = vadd.f32 %v1362_v5, %v1354_v8 }
0x1644   :  { %2811 = vtanh.f32 %v3441_v35 }
0x1651   :  { %v2812_v38 = vpop.eup %2811 }
0x1652   :  { %1367 = vrot.lane.b32.xlu0 %v2812_v38, %s2886_s17 }
0x16c4   :  { %v1368_v52 = vpop.permute.xlu0 %1367 }
0x16c5   :  { %v1370_v39 = vmul.f32 %v1368_v52, %v1352_v32 }
0x16c7   :  { %1372 = vrot.lane.b32.xlu1 %v1370_v39, %s2885_s14 }
0x1739   :  { %v3446_v42 = vpop.permute.xlu1 %1372 }
0x173a   :  { %v1375_v43 = vsel %vm44_vm1, %v3446_v42, %v3441_v35 }
0x173b   :  { %2626 = vmatmul.mubr.msk.f32.vlgmr.msra.gmra.mxu0 %vm201_vm5, %v1375_v43 }
0x173c   :  { %2648 = vmatpush3.msra.mxu0 %v3455_v61  ;;  %2663 = vmatprep.mubr.msk.f32.mxu0 %vm2882_vm0, %v2881_v0 }
0x173d   :  { %2649 = vmatprep.subr.mxu0 %v2881_v0 }
0x173e   :  { %2650 = vmatpush3.msra.mxu0 %v3464_v44 }
0x173f   :  { %2651 = vmatprep.subr.mxu0 %v2881_v0 }
0x1740   :  { %2652 = vmatpush3.msra.mxu0 %v3471_v45 }
0x1741   :  { %2653 = vmatprep.subr.mxu0 %v2881_v0 }
0x1742   :  { %2654 = vmatpush3.msra.mxu0 %v3478_v46 }
0x1743   :  { %2655 = vmatprep.subr.mxu0 %v2881_v0 }
0x1744   :  { %2656 = vmatpush3.msra.mxu0 %v3485_v48 }
0x1745   :  { %2657 = vmatprep.subr.mxu0 %v2881_v0 }
0x1746   :  { %2658 = vmatpush3.msra.mxu0 %v3492_v50 }
0x1747   :  { %2659 = vmatprep.subr.mxu0 %v2881_v0 }
0x1748   :  { %2660 = vmatpush3.msra.mxu0 %v3499_v51 }
0x1749   :  { %2661 = vmatprep.subr.mxu0 %v2881_v0 }
0x174a   :  { %2662 = vmatpush3.msra.mxu0 %v3506_v55 }
0x174b   :  { %2685 = vmatprep.subr.mxu0 %v2881_v0 }
0x17fb   :  { %v1445_v30 = vpop.f32.mrf.mxu0 }
0x17fc   :  { %v1456_v57 = vrot.slane %v1445_v30, %v3049_v25 }
0x17fd   :  { %v2627_v62 = vpop.f32.mrf.mxu0 }
0x17fe   :  { %v1457_v63 = vcombine.high %v1456_v57, %v1456_v57  ;;  %v1464_v1 = vrot.slane %v1456_v57, %v3049_v25  ;;  %v2890_v62 = vmov 4  }
0x1800   :  { %v1471_v3 = vrot.slane %v1457_v63, %v3049_v25  ;;  %v1475_v6 = vrot.slane %v1464_v1, %v3046_v24  ;;  %v3534_v63 = vld [vmem:[%s3743_s1] sm:$0x3] }
0x1802   :  { %v1479_v7 = vrot.slane %v1471_v3, %v3046_v24  ;;  %v1482_v9 = vadd.f32 %v1475_v6, %v3060_v33 }
0x1804   :  { %v1483_v10 = vadd.f32 %v1479_v7, %v3064_v36  ;;  %2813 = vtanh.f32 %v1482_v9 }
0x1806   :  { %2815 = vtanh.f32 %v1483_v10 }
0x1811   :  { %v2814_v11 = vpop.eup %2813 }
0x1812   :  { %v1486_v47 = vmul.f32 %v2814_v11, %v3074_v41 }
0x1813   :  { %v2816_v12 = vpop.eup %2815 }
0x1814   :  { %v1488_v21 = vsel %vm314_vm2, %v1486_v47, 0.0  ;;  %v1487_v13 = vmul.f32 %v2816_v12, %v3074_v41 }
0x1815   :  { %1489 = vadd.xlane.f32.xlu0 %v1488_v21 }
0x1816   :  { %v1491_v23 = vsel %vm314_vm2, %v1487_v13, 0.0 }
0x1817   :  { %1492 = vadd.xlane.f32.xlu1 %v1491_v23  ;;  %v3546_v23 = vld [vmem:[%s3742_s3 + $0x38] sm:$0xff] }
0x189e   :  { %v1490_v14 = vpop.xlane.xlu0 %1489 }
0x189f   :  { %v1494_v37 = vmul.f32 1.442695, %v1490_v14  ;;  %v3555_v14 = vld [vmem:[%s3742_s3 + $0x30] sm:$0xff] }
0x18a0   :  { %v1493_v27 = vpop.xlane.xlu1 %1492 }
0x18a1   :  { %2817 = vpow2.f32 %v1494_v37  ;;  %v1496_v28 = vmul.f32 1.442695, %v1493_v27  ;;  %v3569_v37 = vld [vmem:[%s3742_s3 + $0x20] sm:$0xff]  ;;  %v3576_v27 = vld [vmem:[%s3742_s3 + $0x18] sm:$0xff] }
0x18a3   :  { %2819 = vpow2.f32 %v1496_v28  ;;  %v3583_v28 = vld [vmem:[%s3742_s3 + $0x10] sm:$0xff] }
0x18ae   :  { %v2818_v26 = vpop.eup %2817 }
0x18af   :  { %v1503_v15 = vrot.slane %v2818_v26, %v3081_v53 }
0x18b0   :  { %v2820_v4 = vpop.eup %2819 }
0x18b1   :  { %v1507_v16 = vrot.slane %v2820_v4, %v3081_v53 }
0x18b3   :  { %v1508_v17 = vsel %vm337_vm3, %v1507_v16, %v1503_v15 }
0x18b4   :  { %v1510_v18 = vsel %vm340_vm4, %v1508_v17, 0.0 }
0x18b5   :  { %1511 = vadd.xlane.f32.xlu0 %v1510_v18 }
0x193e   :  { %v1512_v49 = vpop.xlane.xlu0 %1511 }
0x193f   :  { %2821 = vrcp.f32 %v1512_v49 }
0x194c   :  { %v2822_v19 = vpop.eup %2821 }
0x194d   :  { %v1522_v2 = vrot.slane %v2822_v19, %v3070_v40  ;;  %v1518_v20 = vrot.slane %v2822_v19, %v3046_v24 }
0x194f   :  { %v1526_v29 = vmul.f32 %v2820_v4, %v1522_v2  ;;  %v1525_v32 = vmul.f32 %v2818_v26, %v1518_v20  ;;  %v3590_v26 = vld [vmem:[%s3742_s3 + $0x8] sm:$0xff]  ;;  %v3597_v4 = vld [vmem:[%s3742_s3] sm:$0xff] }
0x1951   :  { %1534 = vperm.xlu1 %2743, %v1526_v29   ;;  %1529 = vperm.xlu0 %2739, %v1525_v32  }
0x1955   :  { %2744 = vset.pattern.permute.xlu0 %v2890_v62 }
0x1956   :  { %1554 = vperm.xlu0 %2744, %v3534_v63  }
0x195a   :  { %2745 = vset.pattern.permute.xlu0 %v2884_v60 }
0x19cc   :  { %v1535_v31 = vpop.permute.xlu1 %1534  ;;  %v1530_v34 = vpop.permute.xlu0 %1529 }
0x19cd   :  { %v1538_v8 = vmul.f32 %v3400_v56, %v1535_v31  ;;  %v1537_v5 = vmul.f32 %v3406_v59, %v1530_v34 }
0x19cf   :  { %v1546_v38 = vsel %vm314_vm2, %v1538_v8, 0.0  ;;  %v1539_v52 = vsel %vm314_vm2, %v1537_v5, 0.0 }
0x19d0   :  { %v1547_v39 = vrot.slane %v1546_v38, 4  ;;  %v1540_v43 = vrot.slane %v1539_v52, 4 }
0x19d1   :  { %v1555_v15 = vpop.permute.xlu0 %1554 }
0x19d2   :  { %v1548_v30 = vadd.f32 %v1547_v39, %v1546_v38  ;;  %v1541_v57 = vadd.f32 %v1540_v43, %v1539_v52  ;;  %v1557_v16 = vmul.f32 %v1555_v15, %v3181_v54 }
0x19d4   :  { %v1549_v1 = vrot.slane %v1548_v30, 2  ;;  %v1542_v3 = vrot.slane %v1541_v57, 2  ;;  %v1558_v17 = vadd.f32 %v1557_v16, %v3186_v58 }
0x19d6   :  { %v1550_v6 = vadd.f32 %v1549_v1, %v1548_v30  ;;  %v1543_v7 = vadd.f32 %v1542_v3, %v1541_v57 }
0x19d8   :  { %v1551_v9 = vrot.slane %v1550_v6, 1  ;;  %v1544_v10 = vrot.slane %v1543_v7, 1 }
0x19da   :  { %v1545_v11 = vadd.f32 %v1544_v10, %v1543_v7  ;;  %v1552_v47 = vadd.f32 %v1551_v9, %v1550_v6 }
0x19dc   :  { %v1561_v12 = vsel %vm337_vm3, %v1552_v47, %v1545_v11 }
0x19dd   :  { %1562 = vrot.lane.b32.xlu1 %v1561_v12, %s2885_s14 }
0x1a4f   :  { %v1563_v21 = vpop.permute.xlu1 %1562 }
0x1a50   :  { %v1565_v13 = vsel %vm44_vm1, %v3446_v42, %v1563_v21  ;;  %v3562_v42 = vld [vmem:[%s3742_s3 + $0x28] sm:$0xff] }
0x1a51   :  { %2645 = vmatmul.mubr.msk.f32.vlgmr.msra.gmra.mxu1 %vm201_vm5, %v1565_v13 }
0x1a52   :  { %2667 = vmatpush3.msra.mxu1 %v3546_v23  ;;  %2682 = vmatprep.mubr.msk.f32.mxu1 %vm2882_vm0, %v2881_v0 }
0x1a53   :  { %2668 = vmatprep.subr.mxu1 %v2881_v0 }
0x1a54   :  { %2669 = vmatpush3.msra.mxu1 %v3555_v14 }
0x1a55   :  { %2670 = vmatprep.subr.mxu1 %v2881_v0 }
0x1a56   :  { %2671 = vmatpush3.msra.mxu1 %v3562_v42 }
0x1a57   :  { %2672 = vmatprep.subr.mxu1 %v2881_v0 }
0x1a58   :  { %2673 = vmatpush3.msra.mxu1 %v3569_v37 }
0x1a59   :  { %2674 = vmatprep.subr.mxu1 %v2881_v0 }
0x1a5a   :  { %2675 = vmatpush3.msra.mxu1 %v3576_v27 }
0x1a5b   :  { %2676 = vmatprep.subr.mxu1 %v2881_v0 }
0x1a5c   :  { %2677 = vmatpush3.msra.mxu1 %v3583_v28 }
0x1a5d   :  { %2678 = vmatprep.subr.mxu1 %v2881_v0 }
0x1a5e   :  { %2679 = vmatpush3.msra.mxu1 %v3590_v26 }
0x1a5f   :  { %2680 = vmatprep.subr.mxu1 %v2881_v0 }
0x1a60   :  { %2681 = vmatpush3.msra.mxu1 %v3597_v4 }
0x1a61   :  { %2704 = vmatprep.subr.mxu1 %v2881_v0 }
0x1b11   :  { %v1635_v18 = vpop.f32.mrf.mxu1 }
0x1b12   :  { %v1636_v49 = vadd.f32 %v1635_v18, %v1558_v17 }
0x1b13   :  { %v2646_v19 = vpop.f32.mrf.mxu1 }
0x1b14   :  { %2823 = vtanh.f32 %v1636_v49  ;;  %v1639_v20 = vmul.f32 0.5, %v1636_v49 }
0x1b16   :  { %2825 = vtanh.f32 %v1639_v20 }
0x1b21   :  { %v2824_v2 = vpop.eup %2823 }
0x1b22   :  { %1646 = vrot.lane.b32.xlu1 %v2824_v2, %s2886_s17 }
0x1b23   :  { %v2826_v29 = vpop.eup %2825 }
0x1b24   :  { %v1641_v32 = vmul.f32 0.5, %v2826_v29 }
0x1b26   :  { %v1642_v31 = vadd.f32 0.5, %v1641_v32 }
0x1b28   :  { %v1644_v5 = vmul.f32 %v1642_v31, %v3441_v35 }
0x1b94   :  { %v1647_v34 = vpop.permute.xlu1 %1646 }
0x1b95   :  { %v1649_v8 = vmul.f32 %v1647_v34, %v1642_v31 }
0x1b97   :  { %1651 = vrot.lane.b32.xlu1 %v1649_v8, %s2885_s14 }
0x1c09   :  { %v1652_v38 = vpop.permute.xlu1 %1651 }
0x1c0a   :  { %v3606_v52 = vadd.f32 %v1652_v38, %v1644_v5 }
0x1c0c   :  { %2827 = vtanh.f32 %v3606_v52 }
0x1c19   :  { %v2828_v39 = vpop.eup %2827 }
0x1c1a   :  { %1657 = vrot.lane.b32.xlu0 %v2828_v39, %s2886_s17 }
0x1c8c   :  { %v1658_v43 = vpop.permute.xlu0 %1657 }
0x1c8d   :  { %v1660_v30 = vmul.f32 %v1658_v43, %v1642_v31 }
0x1c8f   :  { %1662 = vrot.lane.b32.xlu1 %v1660_v30, %s2885_s14 }
0x1d01   :  { %v3611_v57 = vpop.permute.xlu1 %1662 }
0x1d02   :  { %v1665_v62 = vsel %vm44_vm1, %v3611_v57, %v3606_v52 }
0x1d03   :  { %2664 = vmatmul.mubr.msk.f32.vlgmr.msra.gmra.mxu0 %vm201_vm5, %v1665_v62 }
0x1d04   :  { %2686 = vmatpush3.msra.mxu0 %v3455_v61  ;;  %2701 = vmatprep.mubr.msk.f32.mxu0 %vm2882_vm0, %v2881_v0 }
0x1d05   :  { %2687 = vmatprep.subr.mxu0 %v2881_v0 }
0x1d06   :  { %2688 = vmatpush3.msra.mxu0 %v3464_v44 }
0x1d07   :  { %2689 = vmatprep.subr.mxu0 %v2881_v0 }
0x1d08   :  { %2690 = vmatpush3.msra.mxu0 %v3471_v45 }
0x1d09   :  { %2691 = vmatprep.subr.mxu0 %v2881_v0 }
0x1d0a   :  { %2692 = vmatpush3.msra.mxu0 %v3478_v46 }
0x1d0b   :  { %2693 = vmatprep.subr.mxu0 %v2881_v0 }
0x1d0c   :  { %2694 = vmatpush3.msra.mxu0 %v3485_v48 }
0x1d0d   :  { %2695 = vmatprep.subr.mxu0 %v2881_v0 }
0x1d0e   :  { %2696 = vmatpush3.msra.mxu0 %v3492_v50 }
0x1d0f   :  { %2697 = vmatprep.subr.mxu0 %v2881_v0 }
0x1d10   :  { %2698 = vmatpush3.msra.mxu0 %v3499_v51 }
0x1d11   :  { %2699 = vmatprep.subr.mxu0 %v2881_v0 }
0x1d12   :  { %2700 = vmatpush3.msra.mxu0 %v3506_v55 }
0x1dc3   :  { %v1735_v35 = vpop.f32.mrf.mxu0 }
0x1dc4   :  { %v1746_v61 = vrot.slane %v1735_v35, %v3049_v25 }
0x1dc5   :  { %v2665_v44 = vpop.f32.mrf.mxu0 }
0x1dc6   :  { %v1747_v45 = vcombine.high %v1746_v61, %v1746_v61  ;;  %v1754_v46 = vrot.slane %v1746_v61, %v3049_v25 }
0x1dc8   :  { %v1761_v48 = vrot.slane %v1747_v45, %v3049_v25  ;;  %v1765_v1 = vrot.slane %v1754_v46, %v3046_v24  ;;  %v2891_v45 = vmov 5  }
0x1dca   :  { %v1769_v50 = vrot.slane %v1761_v48, %v3046_v24  ;;  %v1772_v3 = vadd.f32 %v1765_v1, %v3060_v33 }
0x1dcc   :  { %v1773_v51 = vadd.f32 %v1769_v50, %v3064_v36  ;;  %2829 = vtanh.f32 %v1772_v3 }
0x1dce   :  { %2831 = vtanh.f32 %v1773_v51 }
0x1dd9   :  { %v2830_v55 = vpop.eup %2829 }
0x1dda   :  { %v1776_v6 = vmul.f32 %v2830_v55, %v3074_v41 }
0x1ddb   :  { %v2832_v7 = vpop.eup %2831 }
0x1ddc   :  { %v1778_v9 = vsel %vm314_vm2, %v1776_v6, 0.0  ;;  %v1777_v10 = vmul.f32 %v2832_v7, %v3074_v41 }
0x1ddd   :  { %1779 = vadd.xlane.f32.xlu0 %v1778_v9 }
0x1dde   :  { %v1781_v11 = vsel %vm314_vm2, %v1777_v10, 0.0 }
0x1ddf   :  { %1782 = vadd.xlane.f32.xlu1 %v1781_v11 }
0x1e66   :  { %v1780_v47 = vpop.xlane.xlu0 %1779 }
0x1e67   :  { %v1784_v12 = vmul.f32 1.442695, %v1780_v47 }
0x1e68   :  { %v1783_v21 = vpop.xlane.xlu1 %1782 }
0x1e69   :  { %2833 = vpow2.f32 %v1784_v12  ;;  %v1786_v13 = vmul.f32 1.442695, %v1783_v21 }
0x1e6b   :  { %2835 = vpow2.f32 %v1786_v13 }
0x1e76   :  { %v2834_v15 = vpop.eup %2833 }
0x1e77   :  { %v1793_v17 = vrot.slane %v2834_v15, %v3081_v53 }
0x1e78   :  { %v2836_v16 = vpop.eup %2835 }
0x1e79   :  { %v1797_v18 = vrot.slane %v2836_v16, %v3081_v53 }
0x1e7b   :  { %v1798_v49 = vsel %vm337_vm3, %v1797_v18, %v1793_v17 }
0x1e7c   :  { %v1800_v19 = vsel %vm340_vm4, %v1798_v49, 0.0 }
0x1e7d   :  { %1801 = vadd.xlane.f32.xlu0 %v1800_v19 }
0x1f06   :  { %v1802_v2 = vpop.xlane.xlu0 %1801 }
0x1f07   :  { %2837 = vrcp.f32 %v1802_v2 }
0x1f14   :  { %v2838_v20 = vpop.eup %2837 }
0x1f15   :  { %v1812_v29 = vrot.slane %v2838_v20, %v3070_v40  ;;  %v1808_v32 = vrot.slane %v2838_v20, %v3046_v24 }
0x1f17   :  { %v1816_v31 = vmul.f32 %v2836_v16, %v1812_v29  ;;  %v1815_v34 = vmul.f32 %v2834_v15, %v1808_v32 }
0x1f19   :  { %1824 = vperm.xlu1 %2743, %v1816_v31   ;;  %1819 = vperm.xlu0 %2745, %v1815_v34  }
0x1f1d   :  { %2746 = vset.pattern.permute.xlu1 %v2891_v45 }
0x1f94   :  { %v1825_v8 = vpop.permute.xlu1 %1824  ;;  %v1820_v5 = vpop.permute.xlu0 %1819 }
0x1f95   :  { %v1828_v38 = vmul.f32 %v3400_v56, %v1825_v8  ;;  %v1827_v39 = vmul.f32 %v3406_v59, %v1820_v5 }
0x1f97   :  { %v1836_v43 = vsel %vm314_vm2, %v1828_v38, 0.0  ;;  %v1829_v30 = vsel %vm314_vm2, %v1827_v39, 0.0 }
0x1f98   :  { %v1837_v62 = vrot.slane %v1836_v43, 4  ;;  %v1830_v35 = vrot.slane %v1829_v30, 4 }
0x1f9a   :  { %v1838_v61 = vadd.f32 %v1837_v62, %v1836_v43  ;;  %v1831_v44 = vadd.f32 %v1830_v35, %v1829_v30 }
0x1f9c   :  { %v1839_v46 = vrot.slane %v1838_v61, 2  ;;  %v1832_v48 = vrot.slane %v1831_v44, 2 }
0x1f9e   :  { %v1840_v1 = vadd.f32 %v1839_v46, %v1838_v61  ;;  %v1833_v50 = vadd.f32 %v1832_v48, %v1831_v44 }
0x1fa0   :  { %v1841_v3 = vrot.slane %v1840_v1, 1  ;;  %v1834_v51 = vrot.slane %v1833_v50, 1 }
0x1fa2   :  { %v1835_v55 = vadd.f32 %v1834_v51, %v1833_v50  ;;  %v1842_v6 = vadd.f32 %v1841_v3, %v1840_v1 }
0x1fa4   :  { %v1851_v7 = vsel %vm337_vm3, %v1842_v6, %v1835_v55 }
0x1fa5   :  { %1852 = vrot.lane.b32.xlu1 %v1851_v7, %s2885_s14 }
0x1fa9   :  { %1844 = vperm.xlu1 %2746, %v3534_v63  }
0x1fad   :  { %2747 = vset.pattern.permute.xlu1 %v2884_v60 }
0x2017   :  { %v1853_v9 = vpop.permute.xlu1 %1852 }
0x2018   :  { %v1855_v10 = vsel %vm44_vm1, %v3611_v57, %v1853_v9 }
0x2019   :  { %2683 = vmatmul.mubr.msk.f32.vlgmr.msra.gmra.mxu1 %vm201_vm5, %v1855_v10 }
0x201a   :  { %2705 = vmatpush3.msra.mxu1 %v3546_v23  ;;  %2720 = vmatprep.mubr.msk.f32.mxu1 %vm2882_vm0, %v2881_v0 }
0x201b   :  { %2706 = vmatprep.subr.mxu1 %v2881_v0 }
0x201c   :  { %2707 = vmatpush3.msra.mxu1 %v3555_v14 }
0x201d   :  { %2708 = vmatprep.subr.mxu1 %v2881_v0 }
0x201e   :  { %2709 = vmatpush3.msra.mxu1 %v3562_v42 }
0x201f   :  { %2710 = vmatprep.subr.mxu1 %v2881_v0 }
0x2020   :  { %2711 = vmatpush3.msra.mxu1 %v3569_v37 }
0x2021   :  { %2712 = vmatprep.subr.mxu1 %v2881_v0 }
0x2022   :  { %2713 = vmatpush3.msra.mxu1 %v3576_v27 }
0x2023   :  { %2714 = vmatprep.subr.mxu1 %v2881_v0 }
0x2024   :  { %2715 = vmatpush3.msra.mxu1 %v3583_v28  ;;  %v1845_v60 = vpop.permute.xlu1 %1844 }
0x2025   :  { %2716 = vmatprep.subr.mxu1 %v2881_v0  ;;  %v1847_v23 = vmul.f32 %v1845_v60, %v3181_v54 }
0x2026   :  { %2717 = vmatpush3.msra.mxu1 %v3590_v26 }
0x2027   :  { %2718 = vmatprep.subr.mxu1 %v2881_v0  ;;  %v1848_v14 = vadd.f32 %v1847_v23, %v3186_v58 }
0x2028   :  { %2719 = vmatpush3.msra.mxu1 %v3597_v4 }
0x20d9   :  { %v1925_v42 = vpop.f32.mrf.mxu1 }
0x20da   :  { %v1926_v37 = vadd.f32 %v1925_v42, %v1848_v14 }
0x20db   :  { %v2684_v27 = vpop.f32.mrf.mxu1 }
0x20dc   :  { %2839 = vtanh.f32 %v1926_v37  ;;  %v1929_v28 = vmul.f32 0.5, %v1926_v37 }
0x20de   :  { %2841 = vtanh.f32 %v1929_v28 }
0x20e9   :  { %v2840_v57 = vpop.eup %2839 }
0x20ea   :  { %1936 = vrot.lane.b32.xlu1 %v2840_v57, %s2886_s17  ;;  %v2892_v57 = vmov 6  }
0x20eb   :  { %v2842_v11 = vpop.eup %2841 }
0x20ec   :  { %v1931_v26 = vmul.f32 0.5, %v2842_v11  ;;  %v2260_v11 = vsub.s32 3, %v3043_v22 }
0x20ee   :  { %v1932_v47 = vadd.f32 0.5, %v1931_v26 }
0x20f0   :  { %v1934_v4 = vmul.f32 %v1932_v47, %v3606_v52 }
0x215c   :  { %v1937_v0 = vpop.permute.xlu1 %1936 }
0x215d   :  { %v1939_v12 = vmul.f32 %v1937_v0, %v1932_v47  ;;  %v2880_v0 = vld [vmem:[%s3741_s4] sm:$0xff]  ;;  %s2893_s4 = smov 96  }
0x215f   :  { %1941 = vrot.lane.b32.xlu1 %v1939_v12, %s2885_s14  ;;  %v2261_v12 = vrot.slane %v2880_v0, %v2260_v11 }
0x21d1   :  { %v1942_v21 = vpop.permute.xlu1 %1941 }
0x21d2   :  { %v3684_v13 = vadd.f32 %v1942_v21, %v1934_v4 }
0x21d4   :  { %2843 = vtanh.f32 %v3684_v13 }
0x21e1   :  { %v2844_v15 = vpop.eup %2843 }
0x21e2   :  { %1947 = vrot.lane.b32.xlu1 %v2844_v15, %s2886_s17 }
0x2254   :  { %v1948_v16 = vpop.permute.xlu1 %1947 }
0x2255   :  { %v1950_v17 = vmul.f32 %v1948_v16, %v1932_v47 }
0x2257   :  { %1952 = vrot.lane.b32.xlu1 %v1950_v17, %s2885_s14 }
0x22c9   :  { %v3689_v18 = vpop.permute.xlu1 %1952 }
0x22ca   :  { %v1955_v49 = vsel %vm44_vm1, %v3689_v18, %v3684_v13 }
0x22cb   :  { %2702 = vmatmul.mubr.msk.f32.vlgmr.msra.gmra.mxu0 %vm201_vm5, %v1955_v49 }
0x238b   :  { %v2025_v52 = vpop.f32.mrf.mxu0 }
0x238c   :  { %v2036_v19 = vrot.slane %v2025_v52, %v3049_v25 }
0x238d   :  { %v2703_v2 = vpop.f32.mrf.mxu0 }
0x238e   :  { %v2037_v20 = vcombine.high %v2036_v19, %v2036_v19  ;;  %v2044_v29 = vrot.slane %v2036_v19, %v3049_v25 }
0x2390   :  { %v2051_v32 = vrot.slane %v2037_v20, %v3049_v25  ;;  %v2055_v31 = vrot.slane %v2044_v29, %v3046_v24 }
0x2392   :  { %v2059_v34 = vrot.slane %v2051_v32, %v3046_v24  ;;  %v2062_v8 = vadd.f32 %v2055_v31, %v3060_v33 }
0x2394   :  { %v2063_v5 = vadd.f32 %v2059_v34, %v3064_v36  ;;  %2845 = vtanh.f32 %v2062_v8 }
0x2396   :  { %2847 = vtanh.f32 %v2063_v5 }
0x23a1   :  { %v2846_v38 = vpop.eup %2845 }
0x23a2   :  { %v2066_v39 = vmul.f32 %v2846_v38, %v3074_v41 }
0x23a3   :  { %v2848_v43 = vpop.eup %2847 }
0x23a4   :  { %v2068_v30 = vsel %vm314_vm2, %v2066_v39, 0.0  ;;  %v2067_v62 = vmul.f32 %v2848_v43, %v3074_v41 }
0x23a5   :  { %2069 = vadd.xlane.f32.xlu0 %v2068_v30 }
0x23a6   :  { %v2071_v25 = vsel %vm314_vm2, %v2067_v62, 0.0 }
0x23a7   :  { %2072 = vadd.xlane.f32.xlu1 %v2071_v25 }
0x242e   :  { %v2070_v35 = vpop.xlane.xlu0 %2069 }
0x242f   :  { %v2074_v61 = vmul.f32 1.442695, %v2070_v35 }
0x2430   :  { %v2073_v44 = vpop.xlane.xlu1 %2072 }
0x2431   :  { %2849 = vpow2.f32 %v2074_v61  ;;  %v2076_v33 = vmul.f32 1.442695, %v2073_v44 }
0x2433   :  { %2851 = vpow2.f32 %v2076_v33 }
0x243e   :  { %v2850_v36 = vpop.eup %2849 }
0x243f   :  { %v2083_v46 = vrot.slane %v2850_v36, %v3081_v53 }
0x2440   :  { %v2852_v45 = vpop.eup %2851 }
0x2441   :  { %v2087_v48 = vrot.slane %v2852_v45, %v3081_v53 }
0x2443   :  { %v2088_v1 = vsel %vm337_vm3, %v2087_v48, %v2083_v46 }
0x2444   :  { %v2090_v41 = vsel %vm340_vm4, %v2088_v1, 0.0 }
0x2445   :  { %2091 = vadd.xlane.f32.xlu0 %v2090_v41 }
0x24ce   :  { %v2092_v50 = vpop.xlane.xlu0 %2091 }
0x24cf   :  { %2853 = vrcp.f32 %v2092_v50 }
0x24dc   :  { %v2854_v3 = vpop.eup %2853 }
0x24dd   :  { %v2102_v51 = vrot.slane %v2854_v3, %v3070_v40  ;;  %v2098_v55 = vrot.slane %v2854_v3, %v3046_v24 }
0x24df   :  { %v2106_v6 = vmul.f32 %v2852_v45, %v2102_v51  ;;  %v2105_v7 = vmul.f32 %v2850_v36, %v2098_v55 }
0x24e1   :  { %2114 = vperm.xlu1 %2747, %v2106_v6   ;;  %2109 = vperm.xlu0 %2745, %v2105_v7  }
0x24e5   :  { %2748 = vset.pattern.permute.xlu0 %v2892_v57 }
0x24e6   :  { %2134 = vperm.xlu0 %2748, %v3534_v63  }
0x255c   :  { %v2115_v9 = vpop.permute.xlu1 %2114  ;;  %v2110_v10 = vpop.permute.xlu0 %2109 }
0x255d   :  { %v2118_v53 = vmul.f32 %v3400_v56, %v2115_v9  ;;  %v2117_v60 = vmul.f32 %v3406_v59, %v2110_v10 }
0x255f   :  { %v2126_v23 = vsel %vm314_vm2, %v2118_v53, 0.0  ;;  %v2119_v14 = vsel %vm314_vm2, %v2117_v60, 0.0 }
0x2560   :  { %v2127_v42 = vrot.slane %v2126_v23, 4  ;;  %v2120_v37 = vrot.slane %v2119_v14, 4 }
0x2561   :  { %v2135_v2 = vpop.permute.xlu0 %2134 }
0x2562   :  { %v2128_v27 = vadd.f32 %v2127_v42, %v2126_v23  ;;  %v2121_v40 = vadd.f32 %v2120_v37, %v2119_v14  ;;  %v2137_v20 = vmul.f32 %v2135_v2, %v3181_v54  ;;  %v2243_v54 = vsub.s32 2, %v3043_v22 }
0x2564   :  { %v2129_v24 = vrot.slane %v2128_v27, 2  ;;  %v2122_v28 = vrot.slane %v2121_v40, 2  ;;  %v2138_v29 = vadd.f32 %v2137_v20, %v3186_v58  ;;  %v2244_v62 = vrot.slane %v2880_v0, %v2243_v54 }
0x2566   :  { %v2130_v26 = vadd.f32 %v2129_v24, %v2128_v27  ;;  %v2123_v56 = vadd.f32 %v2122_v28, %v2121_v40 }
0x2568   :  { %v2131_v47 = vrot.slane %v2130_v26, 1  ;;  %v2124_v59 = vrot.slane %v2123_v56, 1 }
0x256a   :  { %v2125_v4 = vadd.f32 %v2124_v59, %v2123_v56  ;;  %v2132_v21 = vadd.f32 %v2131_v47, %v2130_v26 }
0x256c   :  { %v2141_v15 = vsel %vm337_vm3, %v2132_v21, %v2125_v4  ;;  %v2263_v16 = vmul.f32 %v2261_v12, %v2132_v21  ;;  %v2262_v63 = vmul.f32 %v2261_v12, %v2125_v4 }
0x256d   :  { %2142 = vrot.lane.b32.xlu1 %v2141_v15, %s2885_s14 }
0x256e   :  { %v2266_v17 = vrot.slane %v2263_v16, 7 }
0x2570   :  { %v2267_v49 = vsel %vm337_vm3, %v2266_v17, %v2262_v63 }
0x2571   :  { %v2269_v46 = vsel %vm2254_vm6, %v2267_v49, 0.0 }
0x25df   :  { %v2143_v52 = vpop.permute.xlu1 %2142 }
0x25e0   :  { %v2145_v19 = vsel %vm44_vm1, %v3689_v18, %v2143_v52 }
0x25e1   :  { %2721 = vmatmul.mubr.msk.f32.vlgmr.msra.gmra.mxu1 %vm201_vm5, %v2145_v19 }
0x26a1   :  { %v2215_v32 = vpop.f32.mrf.mxu1 }
0x26a2   :  { %v2216_v31 = vadd.f32 %v2215_v32, %v2138_v29 }
0x26a3   :  { %v2722_v34 = vpop.f32.mrf.mxu1 }
0x26a4   :  { %2855 = vtanh.f32 %v2216_v31  ;;  %v2219_v5 = vmul.f32 0.5, %v2216_v31 }
0x26a6   :  { %2857 = vtanh.f32 %v2219_v5 }
0x26b1   :  { %v2856_v8 = vpop.eup %2855 }
0x26b2   :  { %2226 = vrot.lane.b32.xlu1 %v2856_v8, %s2886_s17 }
0x26b3   :  { %v2858_v38 = vpop.eup %2857 }
0x26b4   :  { %v2221_v39 = vmul.f32 0.5, %v2858_v38 }
0x26b6   :  { %v2222_v43 = vadd.f32 0.5, %v2221_v39 }
0x26b8   :  { %v2224_v58 = vmul.f32 %v2222_v43, %v3684_v13  ;;  %v2275_v13 = vsub.s32 4, %v3043_v22 }
0x26ba   :  { %v2276_v41 = vrot.slane %v2880_v0, %v2275_v13 }
0x2724   :  { %v2227_v18 = vpop.permute.xlu1 %2226 }
0x2725   :  { %v2229_v30 = vmul.f32 %v2227_v18, %v2222_v43 }
0x2727   :  { %2231 = vrot.lane.b32.xlu1 %v2229_v30, %s2885_s14 }
0x272b   :  { %2246 = vrot.lane.b32.xlu1 %v2244_v62, %s2893_s4 }
0x2799   :  { %v2232_v25 = vpop.permute.xlu1 %2231 }
0x279a   :  { %v2234_v35 = vadd.f32 %v2232_v25, %v2224_v58 }
0x279c   :  { %2859 = vtanh.f32 %v2234_v35 }
0x279d   :  { %v2247_v33 = vpop.permute.xlu1 %2246 }
0x27a9   :  { %v2860_v61 = vpop.eup %2859 }
0x27aa   :  { %2237 = vrot.lane.b32.xlu0 %v2860_v61, %s2886_s17 }
0x281c   :  { %v2238_v44 = vpop.permute.xlu0 %2237 }
0x281d   :  { %v2240_v36 = vmul.f32 %v2238_v44, %v2222_v43 }
0x281f   :  { %v2249_v45 = vmul.f32 %v2247_v33, %v2240_v36 }
0x2821   :  { %2251 = vrot.lane.b32.xlu0 %v2249_v45, %s2885_s14 }
0x2840   :  { %2270 = vadd.xlane.f32.xlu0 %v2269_v46 }
0x2893   :  { %v2252_v48 = vpop.permute.xlu0 %2251 }
0x2894   :  { %v2255_v1 = vsel %vm2254_vm6, %v2252_v48, 0.0 }
0x2895   :  { %2256 = vadd.xlane.f32.xlu1 %v2255_v1 }
0x28c9   :  { %v2271_v50 = vpop.xlane.xlu0 %2270 }
0x291e   :  { %v2257_v3 = vpop.xlane.xlu1 %2256 }
0x291f   :  { %v2272_v51 = vadd.f32 %v2271_v50, %v2257_v3 }
0x2921   :  { %v2277_v55 = vadd.f32 %v2276_v41, %v2272_v51 }
0x2923   :  { %2279 = vst.msk [vmem:[%s3744_s5] sm:$0x3] %vm2278_vm7, %v2277_v55 }

</bundles_post_ra>
